<compile_context>
chip_gen: v7x
topology: tpu7x:2x2x1
jax: 0.10.0
libtpu: 0.0.40
codegen_flags: <defaults>
</compile_context>

<pallas_src>
import jax
import jax.numpy as jnp
from jax.experimental import pallas as pl
from jax.experimental.pallas import tpu as pltpu


def _round_up(x, m):
    return ((x + m - 1) // m) * m


def _mlp_decoder_kernel(x_ref, bias_ref, *rest):
    """Fused 8-layer MLP on one (TB, n_z) batch tile.

    rest = (w0_ref, ..., w7_ref, out_ref).  Weight BlockSpecs use constant
    index_maps so the weights stay VMEM-resident across batch tiles.
    """
    out_ref = rest[-1]
    w_refs = rest[:-1]
    n_layers = len(w_refs)

    biases = bias_ref[...]                      # (n_layers, max_out_dim) f32
    h = x_ref[...].astype(jnp.float32)          # activations kept in f32

    for i, w_ref in enumerate(w_refs):
        w = w_ref[...]                          # f32 or bf16, fed to MXU as-is
        out_dim = w.shape[1]
        lhs = h if h.dtype == w.dtype else h.astype(w.dtype)
        h = jnp.dot(lhs, w, preferred_element_type=jnp.float32)
        h = h + biases[i:i + 1, :out_dim]       # lane-aligned static slice
        if i < n_layers - 1:
            h = jnp.maximum(h, 0.0)             # ReLU
        else:
            h = jax.nn.sigmoid(h)               # final Sigmoid (EUP)
    out_ref[...] = h.astype(out_ref.dtype)


def linear_decoder_forward(x, weights, biases, *, block_rows=128):
    """x: (B, n_z).  Returns (B, 1, dim_output) float32 (PyTorch semantics)."""
    B, n_z = x.shape
    n_layers = len(weights)
    dim_output = weights[-1].shape[1]
    max_out = max(w.shape[1] for w in weights)

    # Pack the 8 tiny biases into a single (n_layers, max_out) f32 operand.
    packed_b = jnp.zeros((n_layers, max_out), jnp.float32)
    for i, b in enumerate(biases):
        packed_b = packed_b.at[i, : b.shape[-1]].set(
            b.reshape(-1).astype(jnp.float32))

    # Batch tiling: full-height MXU tiles, zero-padded rows sliced off after.
    # TB=128 by default (good on all chips; bump block_rows=256 on v6e/v7x
    # for very large batches).  TB <= 256 keeps the live f32 activation slab
    # (TB x 512) small enough to avoid vreg spill across the 8 layers.
    TB = min(block_rows, _round_up(B, 8))
    B_pad = _round_up(B, TB)
    if B_pad != B:
        x = jnp.pad(x, ((0, B_pad - B), (0, 0)))
    grid = (B_pad // TB,)

    in_arrays = [x, packed_b] + list(weights)
    in_specs = [
        pl.BlockSpec((TB, n_z), lambda i: (i, 0)),        # batch-tiled
        pl.BlockSpec(packed_b.shape, lambda i: (0, 0)),   # VMEM-resident
    ] + [
        pl.BlockSpec(w.shape, lambda i: (0, 0))           # VMEM-resident
        for w in weights
    ]

    out = pl.pallas_call(
        _mlp_decoder_kernel,
        out_shape=jax.ShapeDtypeStruct((B_pad, dim_output), jnp.float32),
        grid=grid,
        in_specs=in_specs,
        out_specs=pl.BlockSpec((TB, dim_output), lambda i: (i, 0)),
        compiler_params=pltpu.CompilerParams(
            # Independent batch tiles -> shardable across v7x's 2 TCs.
            dimension_semantics=("parallel",),
        ),
    )(*in_arrays)

    # PyTorch: x.unsqueeze(dim=1) before the MLP -> output (B, 1, dim_output).
    return out[:B].reshape(B, 1, dim_output)


def make_params(key, n_z, dim_h, img_size, w_dtype=jnp.float32):
    """Deterministic synthetic init for the 8 Linear layers (biases stay f32)."""
    dim_output = img_size ** 2
    dims = [n_z, dim_h, dim_h * 2, dim_h * 4, dim_h * 8,
            dim_h * 8, dim_h * 8, dim_h * 16, dim_output]
    weights, biases = [], []
    for i in range(len(dims) - 1):
        key, kw, kb = jax.random.split(key, 3)
        bound = 1.0 / float(dims[i]) ** 0.5
        w = jax.random.uniform(kw, (dims[i], dims[i + 1]), jnp.float32,
                               minval=-bound, maxval=bound)
        b = jax.random.uniform(kb, (1, dims[i + 1]), jnp.float32,
                               minval=-bound, maxval=bound)
        weights.append(w.astype(w_dtype))
        biases.append(b)
    return weights, biases


def reference_forward(x, weights, biases):
    """Pure-JAX reference of the PyTorch module semantics (f32 math)."""
    h = x[:, None, :].astype(jnp.float32)       # unsqueeze(dim=1)
    n = len(weights)
    for i, (w, b) in enumerate(zip(weights, biases)):
        h = h @ w.astype(jnp.float32) + b[None, :, :]
        h = jnp.maximum(h, 0.0) if i < n - 1 else jax.nn.sigmoid(h)
    return h


if __name__ == "__main__":
    # Small shapes consistent with the module: n_z=8, dim_h=32, img_size=16.
    B, n_z, dim_h, img_size = 2, 8, 32, 16

    key = jax.random.PRNGKey(0)
    key, kx = jax.random.split(key)
    x = jax.random.normal(kx, (B, n_z), jnp.float32)

    # f32 weights: must match the PyTorch-semantics reference tightly.
    weights, biases = make_params(key, n_z, dim_h, img_size)
    out = jax.block_until_ready(linear_decoder_forward(x, weights, biases))
    ref = reference_forward(x, weights, biases)
    assert out.shape == (B, 1, img_size ** 2), out.shape
    assert jnp.allclose(out, ref, atol=1e-5, rtol=1e-5)

    # bf16-weight path (v6e/v7x fast MXU + halved weight DMA); f32 accumulate.
    weights_bf16 = [w.astype(jnp.bfloat16) for w in weights]
    out_bf = jax.block_until_ready(
        linear_decoder_forward(x, weights_bf16, biases))
    ref_bf = reference_forward(x, weights_bf16, biases)
    assert out_bf.shape == (B, 1, img_size ** 2), out_bf.shape
    assert jnp.allclose(out_bf, ref_bf, atol=5e-2, rtol=5e-2)

    print("KERNEL_OK")
</pallas_src>

<mosaic_0001>
module attributes {stable_mosaic.version = 11 : i64} {
  func.func @_mlp_decoder_kernel(%arg0: i32, %arg1: memref<8x8xf32, #tpu.memory_space<vmem>>, %arg2: memref<8x512xf32, #tpu.memory_space<vmem>>, %arg3: memref<8x32xf32, #tpu.memory_space<vmem>>, %arg4: memref<32x64xf32, #tpu.memory_space<vmem>>, %arg5: memref<64x128xf32, #tpu.memory_space<vmem>>, %arg6: memref<128x256xf32, #tpu.memory_space<vmem>>, %arg7: memref<256x256xf32, #tpu.memory_space<vmem>>, %arg8: memref<256x256xf32, #tpu.memory_space<vmem>>, %arg9: memref<256x512xf32, #tpu.memory_space<vmem>>, %arg10: memref<512x256xf32, #tpu.memory_space<vmem>>, %arg11: memref<8x256xf32, #tpu.memory_space<vmem>>) attributes {dimension_semantics = [#tpu.dimension_semantics<parallel>], iteration_bounds = array<i64: 1>, scalar_prefetch = 0 : i64, scratch_operands = 0 : i64, tpu.core_type = #tpu.core_type<tc>, window_params = [{transform_indices = @transform_0, window_bounds = array<i64: 8, 8>}, {pipeline_mode = #tpu.pipeline_mode<synchronous>, transform_indices = @transform_1, window_bounds = array<i64: 8, 512>}, {pipeline_mode = #tpu.pipeline_mode<synchronous>, transform_indices = @transform_2, window_bounds = array<i64: 8, 32>}, {pipeline_mode = #tpu.pipeline_mode<synchronous>, transform_indices = @transform_3, window_bounds = array<i64: 32, 64>}, {pipeline_mode = #tpu.pipeline_mode<synchronous>, transform_indices = @transform_4, window_bounds = array<i64: 64, 128>}, {pipeline_mode = #tpu.pipeline_mode<synchronous>, transform_indices = @transform_5, window_bounds = array<i64: 128, 256>}, {pipeline_mode = #tpu.pipeline_mode<synchronous>, transform_indices = @transform_6, window_bounds = array<i64: 256, 256>}, {pipeline_mode = #tpu.pipeline_mode<synchronous>, transform_indices = @transform_7, window_bounds = array<i64: 256, 256>}, {pipeline_mode = #tpu.pipeline_mode<synchronous>, transform_indices = @transform_8, window_bounds = array<i64: 256, 512>}, {pipeline_mode = #tpu.pipeline_mode<synchronous>, transform_indices = @transform_9, window_bounds = array<i64: 512, 256>}, {transform_indices = @transform_10, window_bounds = array<i64: 8, 256>}]} {
    %c0 = arith.constant 0 : index
    %c0_0 = arith.constant 0 : index
    %0 = vector.load %arg2[%c0, %c0_0] : memref<8x512xf32, #tpu.memory_space<vmem>>, vector<8x512xf32>
    %c0_1 = arith.constant 0 : index
    %c0_2 = arith.constant 0 : index
    %1 = vector.load %arg1[%c0_1, %c0_2] : memref<8x8xf32, #tpu.memory_space<vmem>>, vector<8x8xf32>
    %c0_3 = arith.constant 0 : index
    %c0_4 = arith.constant 0 : index
    %2 = vector.load %arg3[%c0_3, %c0_4] : memref<8x32xf32, #tpu.memory_space<vmem>>, vector<8x32xf32>
    %cst = arith.constant dense<0.000000e+00> : vector<8x32xf32>
    %3 = tpu.matmul %1, %2, %cst {dimension_numbers = #tpu.dot_dimension_numbers<[1], [0], [0], [1], [0, 0, 1, 1], [], []>} : vector<8x8xf32>, vector<8x32xf32>, vector<8x32xf32> -> vector<8x32xf32>
    %4 = vector.extract_strided_slice %0 {offsets = [0, 0], sizes = [1, 32], strides = [1, 1]} : vector<8x512xf32> to vector<1x32xf32>
    %5 = vector.broadcast %4 : vector<1x32xf32> to vector<8x32xf32>
    %6 = arith.addf %3, %5 : vector<8x32xf32>
    %cst_5 = arith.constant 0.000000e+00 : f32
    %7 = vector.broadcast %cst_5 : f32 to vector<8x32xf32>
    %8 = arith.maximumf %6, %7 : vector<8x32xf32>
    %c0_6 = arith.constant 0 : index
    %c0_7 = arith.constant 0 : index
    %9 = vector.load %arg4[%c0_6, %c0_7] : memref<32x64xf32, #tpu.memory_space<vmem>>, vector<32x64xf32>
    %cst_8 = arith.constant dense<0.000000e+00> : vector<8x64xf32>
    %10 = tpu.matmul %8, %9, %cst_8 {dimension_numbers = #tpu.dot_dimension_numbers<[1], [0], [0], [1], [0, 0, 1, 1], [], []>} : vector<8x32xf32>, vector<32x64xf32>, vector<8x64xf32> -> vector<8x64xf32>
    %11 = vector.extract_strided_slice %0 {offsets = [1, 0], sizes = [1, 64], strides = [1, 1]} : vector<8x512xf32> to vector<1x64xf32>
    %12 = vector.broadcast %11 : vector<1x64xf32> to vector<8x64xf32>
    %13 = arith.addf %10, %12 : vector<8x64xf32>
    %cst_9 = arith.constant 0.000000e+00 : f32
    %14 = vector.broadcast %cst_9 : f32 to vector<8x64xf32>
    %15 = arith.maximumf %13, %14 : vector<8x64xf32>
    %c0_10 = arith.constant 0 : index
    %c0_11 = arith.constant 0 : index
    %16 = vector.load %arg5[%c0_10, %c0_11] : memref<64x128xf32, #tpu.memory_space<vmem>>, vector<64x128xf32>
    %cst_12 = arith.constant dense<0.000000e+00> : vector<8x128xf32>
    %17 = tpu.matmul %15, %16, %cst_12 {dimension_numbers = #tpu.dot_dimension_numbers<[1], [0], [0], [1], [0, 0, 1, 1], [], []>} : vector<8x64xf32>, vector<64x128xf32>, vector<8x128xf32> -> vector<8x128xf32>
    %18 = vector.extract_strided_slice %0 {offsets = [2, 0], sizes = [1, 128], strides = [1, 1]} : vector<8x512xf32> to vector<1x128xf32>
    %19 = vector.broadcast %18 : vector<1x128xf32> to vector<8x128xf32>
    %20 = arith.addf %17, %19 : vector<8x128xf32>
    %cst_13 = arith.constant 0.000000e+00 : f32
    %21 = vector.broadcast %cst_13 : f32 to vector<8x128xf32>
    %22 = arith.maximumf %20, %21 : vector<8x128xf32>
    %c0_14 = arith.constant 0 : index
    %c0_15 = arith.constant 0 : index
    %23 = vector.load %arg6[%c0_14, %c0_15] : memref<128x256xf32, #tpu.memory_space<vmem>>, vector<128x256xf32>
    %cst_16 = arith.constant dense<0.000000e+00> : vector<8x256xf32>
    %24 = tpu.matmul %22, %23, %cst_16 {dimension_numbers = #tpu.dot_dimension_numbers<[1], [0], [0], [1], [0, 0, 1, 1], [], []>} : vector<8x128xf32>, vector<128x256xf32>, vector<8x256xf32> -> vector<8x256xf32>
    %25 = vector.extract_strided_slice %0 {offsets = [3, 0], sizes = [1, 256], strides = [1, 1]} : vector<8x512xf32> to vector<1x256xf32>
    %26 = vector.broadcast %25 : vector<1x256xf32> to vector<8x256xf32>
    %27 = arith.addf %24, %26 : vector<8x256xf32>
    %cst_17 = arith.constant 0.000000e+00 : f32
    %28 = vector.broadcast %cst_17 : f32 to vector<8x256xf32>
    %29 = arith.maximumf %27, %28 : vector<8x256xf32>
    %c0_18 = arith.constant 0 : index
    %c0_19 = arith.constant 0 : index
    %30 = vector.load %arg7[%c0_18, %c0_19] : memref<256x256xf32, #tpu.memory_space<vmem>>, vector<256x256xf32>
    %cst_20 = arith.constant dense<0.000000e+00> : vector<8x256xf32>
    %31 = tpu.matmul %29, %30, %cst_20 {dimension_numbers = #tpu.dot_dimension_numbers<[1], [0], [0], [1], [0, 0, 1, 1], [], []>} : vector<8x256xf32>, vector<256x256xf32>, vector<8x256xf32> -> vector<8x256xf32>
    %32 = vector.extract_strided_slice %0 {offsets = [4, 0], sizes = [1, 256], strides = [1, 1]} : vector<8x512xf32> to vector<1x256xf32>
    %33 = vector.broadcast %32 : vector<1x256xf32> to vector<8x256xf32>
    %34 = arith.addf %31, %33 : vector<8x256xf32>
    %cst_21 = arith.constant 0.000000e+00 : f32
    %35 = vector.broadcast %cst_21 : f32 to vector<8x256xf32>
    %36 = arith.maximumf %34, %35 : vector<8x256xf32>
    %c0_22 = arith.constant 0 : index
    %c0_23 = arith.constant 0 : index
    %37 = vector.load %arg8[%c0_22, %c0_23] : memref<256x256xf32, #tpu.memory_space<vmem>>, vector<256x256xf32>
    %cst_24 = arith.constant dense<0.000000e+00> : vector<8x256xf32>
    %38 = tpu.matmul %36, %37, %cst_24 {dimension_numbers = #tpu.dot_dimension_numbers<[1], [0], [0], [1], [0, 0, 1, 1], [], []>} : vector<8x256xf32>, vector<256x256xf32>, vector<8x256xf32> -> vector<8x256xf32>
    %39 = vector.extract_strided_slice %0 {offsets = [5, 0], sizes = [1, 256], strides = [1, 1]} : vector<8x512xf32> to vector<1x256xf32>
    %40 = vector.broadcast %39 : vector<1x256xf32> to vector<8x256xf32>
    %41 = arith.addf %38, %40 : vector<8x256xf32>
    %cst_25 = arith.constant 0.000000e+00 : f32
    %42 = vector.broadcast %cst_25 : f32 to vector<8x256xf32>
    %43 = arith.maximumf %41, %42 : vector<8x256xf32>
    %c0_26 = arith.constant 0 : index
    %c0_27 = arith.constant 0 : index
    %44 = vector.load %arg9[%c0_26, %c0_27] : memref<256x512xf32, #tpu.memory_space<vmem>>, vector<256x512xf32>
    %cst_28 = arith.constant dense<0.000000e+00> : vector<8x512xf32>
    %45 = tpu.matmul %43, %44, %cst_28 {dimension_numbers = #tpu.dot_dimension_numbers<[1], [0], [0], [1], [0, 0, 1, 1], [], []>} : vector<8x256xf32>, vector<256x512xf32>, vector<8x512xf32> -> vector<8x512xf32>
    %46 = vector.extract_strided_slice %0 {offsets = [6, 0], sizes = [1, 512], strides = [1, 1]} : vector<8x512xf32> to vector<1x512xf32>
    %47 = vector.broadcast %46 : vector<1x512xf32> to vector<8x512xf32>
    %48 = arith.addf %45, %47 : vector<8x512xf32>
    %cst_29 = arith.constant 0.000000e+00 : f32
    %49 = vector.broadcast %cst_29 : f32 to vector<8x512xf32>
    %50 = arith.maximumf %48, %49 : vector<8x512xf32>
    %c0_30 = arith.constant 0 : index
    %c0_31 = arith.constant 0 : index
    %51 = vector.load %arg10[%c0_30, %c0_31] : memref<512x256xf32, #tpu.memory_space<vmem>>, vector<512x256xf32>
    %cst_32 = arith.constant dense<0.000000e+00> : vector<8x256xf32>
    %52 = tpu.matmul %50, %51, %cst_32 {dimension_numbers = #tpu.dot_dimension_numbers<[1], [0], [0], [1], [0, 0, 1, 1], [], []>} : vector<8x512xf32>, vector<512x256xf32>, vector<8x256xf32> -> vector<8x256xf32>
    %53 = vector.extract_strided_slice %0 {offsets = [7, 0], sizes = [1, 256], strides = [1, 1]} : vector<8x512xf32> to vector<1x256xf32>
    %54 = vector.broadcast %53 : vector<1x256xf32> to vector<8x256xf32>
    %55 = arith.addf %52, %54 : vector<8x256xf32>
    %56 = arith.negf %55 : vector<8x256xf32>
    %57 = math.exp %56 : vector<8x256xf32>
    %cst_33 = arith.constant 1.000000e+00 : f32
    %58 = vector.broadcast %cst_33 : f32 to vector<8x256xf32>
    %59 = arith.addf %58, %57 : vector<8x256xf32>
    %60 = arith.divf %58, %59 : vector<8x256xf32>
    %c0_34 = arith.constant 0 : index
    %c0_35 = arith.constant 0 : index
    %61 = vector.load %arg11[%c0_34, %c0_35] : memref<8x256xf32, #tpu.memory_space<vmem>>, vector<8x256xf32>
    tpu.vector_store %arg11[%c0_34, %c0_35], %60 {strides = array<i32>} : memref<8x256xf32, #tpu.memory_space<vmem>>, vector<8x256xf32>,
    return
  }
  func.func @transform_0(%arg0: i32) -> (i32, i32) {
    %c0_i32 = arith.constant 0 : i32
    %c0_i32_0 = arith.constant 0 : i32
    return %arg0, %c0_i32 : i32, i32
  }
  func.func @transform_1(%arg0: i32) -> (i32, i32) {
    %c0_i32 = arith.constant 0 : i32
    %c0_i32_0 = arith.constant 0 : i32
    %c0_i32_1 = arith.constant 0 : i32
    return %c0_i32, %c0_i32_0 : i32, i32
  }
  func.func @transform_2(%arg0: i32) -> (i32, i32) {
    %c0_i32 = arith.constant 0 : i32
    %c0_i32_0 = arith.constant 0 : i32
    %c0_i32_1 = arith.constant 0 : i32
    return %c0_i32, %c0_i32_0 : i32, i32
  }
  func.func @transform_3(%arg0: i32) -> (i32, i32) {
    %c0_i32 = arith.constant 0 : i32
    %c0_i32_0 = arith.constant 0 : i32
    %c0_i32_1 = arith.constant 0 : i32
    return %c0_i32, %c0_i32_0 : i32, i32
  }
  func.func @transform_4(%arg0: i32) -> (i32, i32) {
    %c0_i32 = arith.constant 0 : i32
    %c0_i32_0 = arith.constant 0 : i32
    %c0_i32_1 = arith.constant 0 : i32
    return %c0_i32, %c0_i32_0 : i32, i32
  }
  func.func @transform_5(%arg0: i32) -> (i32, i32) {
    %c0_i32 = arith.constant 0 : i32
    %c0_i32_0 = arith.constant 0 : i32
    %c0_i32_1 = arith.constant 0 : i32
    return %c0_i32, %c0_i32_0 : i32, i32
  }
  func.func @transform_6(%arg0: i32) -> (i32, i32) {
    %c0_i32 = arith.constant 0 : i32
    %c0_i32_0 = arith.constant 0 : i32
    %c0_i32_1 = arith.constant 0 : i32
    return %c0_i32, %c0_i32_0 : i32, i32
  }
  func.func @transform_7(%arg0: i32) -> (i32, i32) {
    %c0_i32 = arith.constant 0 : i32
    %c0_i32_0 = arith.constant 0 : i32
    %c0_i32_1 = arith.constant 0 : i32
    return %c0_i32, %c0_i32_0 : i32, i32
  }
  func.func @transform_8(%arg0: i32) -> (i32, i32) {
    %c0_i32 = arith.constant 0 : i32
    %c0_i32_0 = arith.constant 0 : i32
    %c0_i32_1 = arith.constant 0 : i32
    return %c0_i32, %c0_i32_0 : i32, i32
  }
  func.func @transform_9(%arg0: i32) -> (i32, i32) {
    %c0_i32 = arith.constant 0 : i32
    %c0_i32_0 = arith.constant 0 : i32
    %c0_i32_1 = arith.constant 0 : i32
    return %c0_i32, %c0_i32_0 : i32, i32
  }
  func.func @transform_10(%arg0: i32) -> (i32, i32) {
    %c0_i32 = arith.constant 0 : i32
    %c0_i32_0 = arith.constant 0 : i32
    return %arg0, %c0_i32 : i32, i32
  }
}

</mosaic_0001>

<bundles_post_ra>
// kernel: tpu_custom_call.1
= control target key start
LH: loop header
LB: loop body
LE: loop exit
PB: predicated region body
PF: predicated region fallthrough
CT: control target
= control target key end

     0   :  { %15 = vsyncpa [#allocation3], 0  ;;  %s2481_s0 = inlined_call_operand.hbm [shape: f32[8,8], index: 0, kind: input, shape index: {}]   ;;  %s2482_s1 = inlined_call_operand.hbm [shape: f32[8,512], index: 1, kind: input, shape index: {}]   ;;  %s2483_s2 = inlined_call_operand.hbm [shape: f32[8,32], index: 2, kind: input, shape index: {}]   ;;  %s2484_s3 = inlined_call_operand.hbm [shape: f32[32,64], index: 3, kind: input, shape index: {}]   ;;  %s2485_s4 = inlined_call_operand.hbm [shape: f32[64,128], index: 4, kind: input, shape index: {}]   ;;  %s2486_s5 = inlined_call_operand.hbm [shape: f32[128,256], index: 5, kind: input, shape index: {}]   ;;  %s2487_s6 = inlined_call_operand.hbm [shape: f32[256,256], index: 6, kind: input, shape index: {}]   ;;  %s2488_s7 = inlined_call_operand.hbm [shape: f32[256,256], index: 7, kind: input, shape index: {}]   ;;  %s2489_s8 = inlined_call_operand.hbm [shape: f32[256,512], index: 8, kind: input, shape index: {}]   ;;  %s2490_s9 = inlined_call_operand.hbm [shape: f32[512,256], index: 9, kind: input, shape index: {}]   ;;  %s2491_s10 = inlined_call_operand.hbm [shape: f32[8,256], index: 10, kind: output, shape index: {}]  }
   0x1   :  { %16 = vsyncpa [#allocation6], 0 }
   0x2   :  { %17 = vsyncpa [#allocation9], 0 }
   0x3   :  { %18 = vsyncpa [#allocation12], 0 }
   0x4   :  { %19 = vsyncpa [#allocation15], 0 }
   0x5   :  { %20 = vsyncpa [#allocation18], 0 }
   0x6   :  { %21 = vsyncpa [#allocation4], 0  ;;  %s2206_s13 = smov [#allocation5]   ;;  %s2207_s15 = smov [#allocation8]  }
   0x7   :  { %s38_s14 = sshll.u32 %s2206_s13, 4  ;;  %s57_s16 = sshll.u32 %s2207_s15, 4  ;;  %s39_s14 = int_to_ptr.vmem [resolvable:$true] %s38_s14  ;;  %s2281_s16 = int_to_ptr.vmem [resolvable:$true] %s57_s16 }
   0x8   :  { %s1950_s19 = scalar_lea.hbm %s2482_s1, 512 }
   0x9   :  { %p1951_p0 = scmp.ne.s32.totalorder %s2482_s1, %s1950_s19  ;;  %p1954_p1 = scmp.lt.u32.totalorder %s1950_s19, %s2482_s1 }
   0xb   :  { %p1956_p2 = pnand %p1954_p1, %p1951_p0 }
   0xd   :  { %1959 = shalt.err (!%p1956_p2)
}
   0xe   :  { %s1960_s24 = scalar_lea.vmem %s39_s14, 512  ;;  %p1965_p4 = scmp.lt.s32.totalorder %s39_s14, %s39_s14 }
   0xf   :  { %p1961_p3 = scmp.ne.s32.totalorder %s39_s14, %s1960_s24  ;;  %p1966_p5 = scmp.lt.s32.totalorder %s1960_s24, %s1960_s24 }
  0x11   :  { %p1967_p6 = por %p1966_p5, %p1965_p4 }
  0x13   :  { %p1968_p7 = pnand %p1967_p6, %p1961_p3 }
  0x15   :  { %1971 = shalt.err (!%p1968_p7)
}
  0x16   :  { %41 = dma.hbm_to_vmem [thread:$0]  %s2482_s1, 512, %s39_s14, [#allocation6]  }
  0x17   :  { %s1972_s29 = scalar_lea.hbm %s2484_s3, 512 }
  0x18   :  { %p1973_p8 = scmp.ne.s32.totalorder %s2484_s3, %s1972_s29  ;;  %p1976_p9 = scmp.lt.u32.totalorder %s1972_s29, %s2484_s3 }
  0x1a   :  { %p1978_p10 = pnand %p1976_p9, %p1973_p8 }
  0x1c   :  { %1981 = shalt.err (!%p1978_p10)
}
  0x1d   :  { %s1982_s15 = scalar_lea.vmem %s2281_s16, 512  ;;  %p1987_p12 = scmp.lt.s32.totalorder %s2281_s16, %s2281_s16 }
  0x1e   :  { %p1983_p11 = scmp.ne.s32.totalorder %s2281_s16, %s1982_s15  ;;  %p1988_p13 = scmp.lt.s32.totalorder %s1982_s15, %s1982_s15 }
  0x20   :  { %p1989_p0 = por %p1988_p13, %p1987_p12 }
  0x22   :  { %p1990_p1 = pnand %p1989_p0, %p1983_p11 }
  0x24   :  { %1993 = shalt.err (!%p1990_p1)
}
  0x25   :  { %s2208_s1 = smov 128   ;;  %s2209_s14 = smov 8  }
  0x26   :  { %63 = dma.hbm_to_vmem [thread:$0]  %s2484_s3, 512, %s2281_s16, [#allocation9], %s2208_s1, %s2208_s1, %s2209_s14  }
  0x27   :  { %s2210_s19 = smov [#allocation11]   ;;  %s1994_s23 = scalar_lea.hbm %s2486_s5, 4096 }
  0x28   :  { %s81_s20 = sshll.u32 %s2210_s19, 4  ;;  %p1995_p2 = scmp.ne.s32.totalorder %s2486_s5, %s1994_s23  ;;  %s82_s20 = int_to_ptr.vmem [resolvable:$true] %s81_s20 }
  0x29   :  { %p1998_p3 = scmp.lt.u32.totalorder %s1994_s23, %s2486_s5 }
  0x2b   :  { %p2000_p4 = pnand %p1998_p3, %p1995_p2 }
  0x2d   :  { %2003 = shalt.err (!%p2000_p4)
}
  0x2e   :  { %s2004_s28 = scalar_lea.vmem %s82_s20, 4096  ;;  %p2009_p6 = scmp.lt.s32.totalorder %s82_s20, %s82_s20 }
  0x2f   :  { %p2005_p5 = scmp.ne.s32.totalorder %s82_s20, %s2004_s28  ;;  %p2010_p7 = scmp.lt.s32.totalorder %s2004_s28, %s2004_s28 }
  0x31   :  { %p2011_p8 = por %p2010_p7, %p2009_p6 }
  0x33   :  { %p2012_p9 = pnand %p2011_p8, %p2005_p5 }
  0x35   :  { %2015 = shalt.err (!%p2012_p9)
}
  0x36   :  { %s2211_s3 = smov 256   ;;  %s2212_s16 = smov 16  }
  0x37   :  { %87 = dma.hbm_to_vmem [thread:$0]  %s2486_s5, 4096, %s82_s20, [#allocation12], %s2211_s3, %s2211_s3, %s2212_s16  }
  0x38   :  { %s2213_s11 = smov [#allocation14]   ;;  %s2214_s13 = smov [#allocation2]  }
  0x39   :  { %s105_s12 = sshll.u32 %s2213_s11, 4  ;;  %s28_s15 = sshll.u32 %s2214_s13, 4  ;;  %s106_s12 = int_to_ptr.vmem [resolvable:$true] %s105_s12  ;;  %s29_s15 = int_to_ptr.vmem [resolvable:$true] %s28_s15 }
  0x3a   :  { %s2016_s19 = scalar_lea.hbm %s2488_s7, 8192 }
  0x3b   :  { %p2017_p10 = scmp.ne.s32.totalorder %s2488_s7, %s2016_s19  ;;  %p2020_p11 = scmp.lt.u32.totalorder %s2016_s19, %s2488_s7 }
  0x3d   :  { %p2022_p12 = pnand %p2020_p11, %p2017_p10 }
  0x3f   :  { %2025 = shalt.err (!%p2022_p12)
}
  0x40   :  { %s2026_s5 = scalar_lea.vmem %s106_s12, 8192  ;;  %p2031_p0 = scmp.lt.s32.totalorder %s106_s12, %s106_s12 }
  0x41   :  { %p2027_p13 = scmp.ne.s32.totalorder %s106_s12, %s2026_s5  ;;  %p2032_p1 = scmp.lt.s32.totalorder %s2026_s5, %s2026_s5 }
  0x43   :  { %p2033_p2 = por %p2032_p1, %p2031_p0 }
  0x45   :  { %p2034_p3 = pnand %p2033_p2, %p2027_p13 }
  0x47   :  { %2037 = shalt.err (!%p2034_p3)
}
  0x48   :  { %111 = dma.hbm_to_vmem [thread:$0]  %s2488_s7, 8192, %s106_s12, [#allocation15], %s2211_s3, %s2211_s3, %s2212_s16  }
  0x49   :  { %s2038_s28 = scalar_lea.hbm %s2481_s0, 128 }
  0x4a   :  { %p2039_p4 = scmp.ne.s32.totalorder %s2481_s0, %s2038_s28  ;;  %p2042_p5 = scmp.lt.u32.totalorder %s2038_s28, %s2481_s0 }
  0x4c   :  { %p2044_p6 = pnand %p2042_p5, %p2039_p4 }
  0x4e   :  { %2047 = shalt.err (!%p2044_p6)
}
  0x4f   :  { %s2048_s17 = scalar_lea.vmem %s29_s15, 128  ;;  %p2053_p8 = scmp.lt.s32.totalorder %s29_s15, %s29_s15 }
  0x50   :  { %p2049_p7 = scmp.ne.s32.totalorder %s29_s15, %s2048_s17  ;;  %p2054_p9 = scmp.lt.s32.totalorder %s2048_s17, %s2048_s17 }
  0x52   :  { %p2055_p10 = por %p2054_p9, %p2053_p8 }
  0x54   :  { %p2056_p11 = pnand %p2055_p10, %p2049_p7 }
  0x56   :  { %2059 = shalt.err (!%p2056_p11)
}
  0x57   :  { %31 = dma.hbm_to_vmem [thread:$0]  %s2481_s0, 128, %s29_s15, [#allocation3]  }
  0x58   :  { %s2215_s18 = smov [#allocation7]   ;;  %s2216_s21 = smov [#allocation10]  }
  0x59   :  { %s48_s19 = sshll.u32 %s2215_s18, 4  ;;  %s69_s22 = sshll.u32 %s2216_s21, 4  ;;  %s49_s19 = int_to_ptr.vmem [resolvable:$true] %s48_s19  ;;  %s70_s22 = int_to_ptr.vmem [resolvable:$true] %s69_s22 }
  0x5a   :  { %s2060_s5 = scalar_lea.hbm %s2483_s2, 128 }
  0x5b   :  { %p2061_p12 = scmp.ne.s32.totalorder %s2483_s2, %s2060_s5  ;;  %p2064_p13 = scmp.lt.u32.totalorder %s2060_s5, %s2483_s2 }
  0x5d   :  { %p2066_p0 = pnand %p2064_p13, %p2061_p12 }
  0x5f   :  { %2069 = shalt.err (!%p2066_p0)
}
  0x60   :  { %s2070_s0 = scalar_lea.vmem %s49_s19, 128  ;;  %p2075_p2 = scmp.lt.s32.totalorder %s49_s19, %s49_s19 }
  0x61   :  { %p2071_p1 = scmp.ne.s32.totalorder %s49_s19, %s2070_s0  ;;  %p2076_p3 = scmp.lt.s32.totalorder %s2070_s0, %s2070_s0 }
  0x63   :  { %p2077_p4 = por %p2076_p3, %p2075_p2 }
  0x65   :  { %p2078_p5 = pnand %p2077_p4, %p2071_p1 }
  0x67   :  { %2081 = shalt.err (!%p2078_p5)
}
  0x68   :  { %51 = dma.hbm_to_vmem [thread:$0]  %s2483_s2, 128, %s49_s19, [#allocation6]  }
  0x69   :  { %s2082_s11 = scalar_lea.hbm %s2485_s4, 1024 }
  0x6a   :  { %p2083_p6 = scmp.ne.s32.totalorder %s2485_s4, %s2082_s11  ;;  %p2086_p7 = scmp.lt.u32.totalorder %s2082_s11, %s2485_s4 }
  0x6c   :  { %p2088_p8 = pnand %p2086_p7, %p2083_p6 }
  0x6e   :  { %2091 = shalt.err (!%p2088_p8)
}
  0x6f   :  { %s2092_s18 = scalar_lea.vmem %s70_s22, 1024  ;;  %p2097_p10 = scmp.lt.s32.totalorder %s70_s22, %s70_s22 }
  0x70   :  { %p2093_p9 = scmp.ne.s32.totalorder %s70_s22, %s2092_s18  ;;  %p2098_p11 = scmp.lt.s32.totalorder %s2092_s18, %s2092_s18 }
  0x72   :  { %p2099_p12 = por %p2098_p11, %p2097_p10 }
  0x74   :  { %p2100_p13 = pnand %p2099_p12, %p2093_p9 }
  0x76   :  { %2103 = shalt.err (!%p2100_p13)
}
  0x77   :  { %75 = dma.hbm_to_vmem [thread:$0]  %s2485_s4, 1024, %s70_s22, [#allocation9], %s2208_s1, %s2208_s1, %s2209_s14  }
  0x78   :  { %s2217_s21 = smov [#allocation13]   ;;  %s2218_s24 = smov [#allocation16]  }
  0x79   :  { %s93_s23 = sshll.u32 %s2217_s21, 4  ;;  %s117_s5 = sshll.u32 %s2218_s24, 4  ;;  %s94_s23 = int_to_ptr.vmem [resolvable:$true] %s93_s23  ;;  %s118_s5 = int_to_ptr.vmem [resolvable:$true] %s117_s5 }
  0x7a   :  { %s2104_s26 = scalar_lea.hbm %s2487_s6, 8192 }
  0x7b   :  { %p2105_p0 = scmp.ne.s32.totalorder %s2487_s6, %s2104_s26  ;;  %p2108_p1 = scmp.lt.u32.totalorder %s2104_s26, %s2487_s6 }
  0x7d   :  { %p2110_p2 = pnand %p2108_p1, %p2105_p0 }
  0x7f   :  { %2113 = shalt.err (!%p2110_p2)
}
  0x80   :  { %s2114_s4 = scalar_lea.vmem %s94_s23, 8192  ;;  %p2119_p4 = scmp.lt.s32.totalorder %s94_s23, %s94_s23 }
  0x81   :  { %p2115_p3 = scmp.ne.s32.totalorder %s94_s23, %s2114_s4  ;;  %p2120_p5 = scmp.lt.s32.totalorder %s2114_s4, %s2114_s4 }
  0x83   :  { %p2121_p6 = por %p2120_p5, %p2119_p4 }
  0x85   :  { %p2122_p7 = pnand %p2121_p6, %p2115_p3 }
  0x87   :  { %2125 = shalt.err (!%p2122_p7)
}
  0x88   :  { %99 = dma.hbm_to_vmem [thread:$0]  %s2487_s6, 8192, %s94_s23, [#allocation12], %s2211_s3, %s2211_s3, %s2212_s16  }
  0x89   :  { %s2126_s30 = scalar_lea.hbm %s2489_s8, 16384 }
  0x8a   :  { %p2127_p8 = scmp.ne.s32.totalorder %s2489_s8, %s2126_s30  ;;  %p2130_p9 = scmp.lt.u32.totalorder %s2126_s30, %s2489_s8 }
  0x8c   :  { %p2132_p10 = pnand %p2130_p9, %p2127_p8 }
  0x8e   :  { %2135 = shalt.err (!%p2132_p10)
}
  0x8f   :  { %s2136_s12 = scalar_lea.vmem %s118_s5, 16384  ;;  %p2141_p12 = scmp.lt.s32.totalorder %s118_s5, %s118_s5 }
  0x90   :  { %p2137_p11 = scmp.ne.s32.totalorder %s118_s5, %s2136_s12  ;;  %p2142_p13 = scmp.lt.s32.totalorder %s2136_s12, %s2136_s12 }
  0x92   :  { %p2143_p0 = por %p2142_p13, %p2141_p12 }
  0x94   :  { %p2144_p1 = pnand %p2143_p0, %p2137_p11 }
  0x96   :  { %2147 = shalt.err (!%p2144_p1)
}
  0x97   :  { %s2219_s6 = smov 512   ;;  %s2220_s18 = smov 32  }
  0x98   :  { %123 = dma.hbm_to_vmem [thread:$0]  %s2489_s8, 16384, %s118_s5, [#allocation15], %s2219_s6, %s2219_s6, %s2220_s18  }
  0x99   :  { %s2221_s21 = smov [#allocation17]   ;;  %s2148_s25 = scalar_lea.hbm %s2490_s9, 16384 }
  0x9a   :  { %s129_s23 = sshll.u32 %s2221_s21, 4  ;;  %p2149_p2 = scmp.ne.s32.totalorder %s2490_s9, %s2148_s25  ;;  %s130_s23 = int_to_ptr.vmem [resolvable:$true] %s129_s23 }
  0x9b   :  { %p2152_p3 = scmp.lt.u32.totalorder %s2148_s25, %s2490_s9 }
  0x9d   :  { %p2154_p4 = pnand %p2152_p3, %p2149_p2 }
  0x9f   :  { %2157 = shalt.err (!%p2154_p4)
}
  0xa0   :  { %s2158_s28 = scalar_lea.vmem %s130_s23, 16384  ;;  %p2163_p6 = scmp.lt.s32.totalorder %s130_s23, %s130_s23 }
  0xa1   :  { %p2159_p5 = scmp.ne.s32.totalorder %s130_s23, %s2158_s28  ;;  %p2164_p7 = scmp.lt.s32.totalorder %s2158_s28, %s2158_s28 }
  0xa3   :  { %p2165_p8 = por %p2164_p7, %p2163_p6 }
  0xa5   :  { %p2166_p9 = pnand %p2165_p8, %p2159_p5 }
  0xa7   :  { %2169 = shalt.err (!%p2166_p9)
}
  0xa8   :  { %135 = dma.hbm_to_vmem [thread:$0]  %s2490_s9, 16384, %s130_s23, [#allocation18], %s2211_s3, %s2211_s3, %s2212_s16  }
  0xa9   :  { %2192 = dma.done.wait [#allocation3], 128  }
  0xaa   :  { %2193 = vsyncadd [#allocation3], 4294967168 }
  0xab   :  { %2194 = dma.done.wait [#allocation6], 640  }
  0xac   :  { %2195 = vsyncadd [#allocation6], 4294966656 }
  0xad   :  { %2196 = dma.done.wait [#allocation9], 1536  }
  0xae   :  { %2197 = vsyncadd [#allocation9], 4294965760 }
  0xaf   :  { %2198 = dma.done.wait [#allocation12], 12288  }
  0xb0   :  { %2199 = vsyncadd [#allocation12], 4294955008 }
  0xb1   :  { %2200 = dma.done.wait [#allocation15], 24576  }
  0xb2   :  { %2201 = vsyncadd [#allocation15], 4294942720 }
  0xb3   :  { %2202 = dma.done.wait [#allocation18], 16384  }
  0xb4   :  { %2203 = vsyncadd [#allocation18], 4294950912  ;;  %v2222_v0 = vmov 0.0   ;;  %vm2223_vm0 = vmmov 0   ;;  %vm176_vm1 = vcmask 64512   ;;  %v171_v1 = vld [vmem:[#allocation7] sm:$0xff]  ;;  %v172_v10 = vlaneseq }
  0xb5   :  { %1447 = vmatprep.subr.mxu0 %v2222_v0  ;;  %1449 = vmatprep.mubr.msk.f32.mxu0 %vm2223_vm0, %v2222_v0  ;;  %v170_v2 = vld [vmem:[#allocation2] sm:$0xff]  ;;  %v251_v3 = vld [vmem:[#allocation8] sm:$0xff]  ;;  %v252_v4 = vld [vmem:[#allocation8 + $0x8] sm:$0xff]  ;;  %v2224_v5 = vmov 0.0|0.0   ;;  %vm259_vm2 = vcmask 261120   ;;  %vm346_vm3 = vcmask 523264  }
  0xb6   :  { %525 = vmatprep.mubr.f32.mxu1 %v2222_v0  ;;  %1448 = vmatpush3.msra.mxu0 %v171_v1  ;;  %v1483_v6 = vpack.c.bf16 %v252_v4, %v251_v3  ;;  %v253_v7 = vld [vmem:[#allocation8 + $0x10] sm:$0xff]  ;;  %v254_v8 = vld [vmem:[#allocation8 + $0x18] sm:$0xff]  ;;  %v2428_v11 = vshrl.u32 %v172_v10, 7  ;;  %v334_v15 = vld [vmem:[#allocation10] sm:$0xff]  ;;  %s2225_s9 = smov [#allocation19]  }
  0xb7   :  { %1450 = vmatmul.mubr.msk.f32.vlgmr.msra.gmra.mrb[0].mxu0 %vm176_vm1, %v170_v2  ;;  %1482 = vmatprep.subr.bf16.mxu0 %v2224_v5  ;;  %v1486_v9 = vpack.c.bf16 %v254_v8, %v253_v7  ;;  %v2431_v13 = vld [vmem:[#allocation5] sm:$0xff]  ;;  %v335_v16 = vld [vmem:[#allocation10 + $0x8] sm:$0xff]  ;;  %v336_v22 = vld [vmem:[#allocation10 + $0x10] sm:$0xff]  ;;  %s1412_s3 = sshll.u32 %s2225_s9, 4  ;;  %s1413_s3 = int_to_ptr.vmem [resolvable:$true] %s1412_s3 }
  0xb8   :  { %1460 = vmatprep.mubr.msk.f32.mxu0 %vm2223_vm0, %v2222_v0  ;;  %1484 = vmatpush3.bf16.msra.mxu0 %v1483_v6  ;;  %v174_v12 = vsub.s32 0, %v2428_v11  ;;  %v1489_v20 = vpack.c.bf16 %v335_v16, %v334_v15  ;;  %v337_v23 = vld [vmem:[#allocation10 + $0x18] sm:$0xff]  ;;  %v338_v25 = vld [vmem:[#allocation10 + $0x20] sm:$0xff]  ;;  %v339_v26 = vld [vmem:[#allocation10 + $0x28] sm:$0xff]  ;;  %s2170_s16 = scalar_lea.vmem %s1413_s3, 256  ;;  %p2175_p11 = scmp.lt.s32.totalorder %s1413_s3, %s1413_s3 }
  0xb9   :  { %1485 = vmatprep.subr.bf16.mxu0 %v2224_v5  ;;  %v1492_v24 = vpack.c.bf16 %v337_v23, %v336_v22  ;;  %v1495_v27 = vpack.c.bf16 %v339_v26, %v338_v25  ;;  %v340_v28 = vld [vmem:[#allocation10 + $0x30] sm:$0xff]  ;;  %v341_v29 = vld [vmem:[#allocation10 + $0x38] sm:$0xff]  ;;  %v422_v31 = vld [vmem:[#allocation11 + $0x8] sm:$0xff]  ;;  %v344_v26 = vsub.s32 2, %v2428_v11  ;;  %p2171_p10 = scmp.ne.s32.totalorder %s1413_s3, %s2170_s16  ;;  %p2176_p12 = scmp.lt.s32.totalorder %s2170_s16, %s2170_s16 }
  0xba   :  { %v175_v14 = vrot.slane %v2431_v13, %v174_v12  ;;  %v1498_v30 = vpack.c.bf16 %v341_v29, %v340_v28  ;;  %v424_v32 = vld [vmem:[#allocation11 + $0x18] sm:$0xff]  ;;  %v421_v33 = vld [vmem:[#allocation11] sm:$0xff]  ;;  %v423_v35 = vld [vmem:[#allocation11 + $0x10] sm:$0xff] }
  0xbb   :  { %v1500_v34 = vpack.c.bf16 %v424_v32, %v422_v31  ;;  %v426_v36 = vld [vmem:[#allocation11 + $0x28] sm:$0xff]  ;;  %v428_v37 = vld [vmem:[#allocation11 + $0x38] sm:$0xff]  ;;  %v1502_v38 = vpack.c.bf16 %v423_v35, %v421_v33  ;;  %v425_v40 = vld [vmem:[#allocation11 + $0x20] sm:$0xff]  ;;  %p2177_p13 = por %p2176_p12, %p2175_p11 }
  0xbc   :  { %1487 = vmatpush3.bf16.msra.mxu0 %v1486_v9  ;;  %v1504_v39 = vpack.c.bf16 %v428_v37, %v426_v36  ;;  %v427_v41 = vld [vmem:[#allocation11 + $0x30] sm:$0xff]  ;;  %v430_v42 = vld [vmem:[#allocation11 + $0x48] sm:$0xff]  ;;  %v432_v43 = vld [vmem:[#allocation11 + $0x58] sm:$0xff]  ;;  %v257_v9 = vsub.s32 1, %v2428_v11 }
  0xbd   :  { %1488 = vmatprep.subr.bf16.mxu0 %v2224_v5  ;;  %1501 = vmatprep.subr.bf16.mxu1 %v1500_v34  ;;  %v1506_v44 = vpack.c.bf16 %v427_v41, %v425_v40  ;;  %v1508_v45 = vpack.c.bf16 %v432_v43, %v430_v42  ;;  %v429_v46 = vld [vmem:[#allocation11 + $0x40] sm:$0xff]  ;;  %v431_v47 = vld [vmem:[#allocation11 + $0x50] sm:$0xff]  ;;  %v434_v48 = vld [vmem:[#allocation11 + $0x68] sm:$0xff]  ;;  %p2178_p0 = pnand %p2177_p13, %p2171_p10 }
  0xbe   :  { %1503 = vmatpush1.bf16.msra.mxu1 %v1502_v38  ;;  %v436_v49 = vld [vmem:[#allocation11 + $0x78] sm:$0xff]  ;;  %v1510_v50 = vpack.c.bf16 %v431_v47, %v429_v46  ;;  %v433_v52 = vld [vmem:[#allocation11 + $0x60] sm:$0xff]  ;;  %v435_v53 = vld [vmem:[#allocation11 + $0x70] sm:$0xff]  ;;  %v258_v10 = vrot.slane %v2431_v13, %v257_v9 }
  0xbf   :  { %1505 = vmatprep.subr.bf16.mxu1 %v1504_v39  ;;  %v1512_v51 = vpack.c.bf16 %v436_v49, %v434_v48  ;;  %v438_v54 = vld [vmem:[#allocation11 + $0x88] sm:$0xff]  ;;  %v440_v55 = vld [vmem:[#allocation11 + $0x98] sm:$0xff]  ;;  %v1514_v56 = vpack.c.bf16 %v435_v53, %v433_v52  ;;  %v437_v58 = vld [vmem:[#allocation11 + $0x80] sm:$0xff] }
  0xc0   :  { %v1516_v57 = vpack.c.bf16 %v440_v55, %v438_v54  ;;  %v439_v59 = vld [vmem:[#allocation11 + $0x90] sm:$0xff]  ;;  %v442_v60 = vld [vmem:[#allocation11 + $0xa8] sm:$0xff]  ;;  %v444_v61 = vld [vmem:[#allocation11 + $0xb8] sm:$0xff] }
  0xc1   :  { %v1518_v62 = vpack.c.bf16 %v439_v59, %v437_v58  ;;  %v1520_v63 = vpack.c.bf16 %v444_v61, %v442_v60  ;;  %v443_v1 = vld [vmem:[#allocation11 + $0xb0] sm:$0xff]  ;;  %v446_v2 = vld [vmem:[#allocation11 + $0xc8] sm:$0xff]  ;;  %v448_v3 = vld [vmem:[#allocation11 + $0xd8] sm:$0xff] }
  0xc2   :  { %1507 = vmatpush1.bf16.msra.mxu1 %v1506_v44  ;;  %v445_v6 = vld [vmem:[#allocation11 + $0xc0] sm:$0xff]  ;;  %v447_v7 = vld [vmem:[#allocation11 + $0xd0] sm:$0xff]  ;;  %v535_v23 = vld [vmem:[#allocation13 + $0x8] sm:$0xff] }
  0xc3   :  { %1509 = vmatprep.subr.bf16.mxu1 %v1508_v45  ;;  %v1526_v8 = vpack.c.bf16 %v447_v7, %v445_v6  ;;  %v534_v28 = vld [vmem:[#allocation13] sm:$0xff]  ;;  %v536_v29 = vld [vmem:[#allocation13 + $0x10] sm:$0xff]  ;;  %v539_v31 = vld [vmem:[#allocation13 + $0x28] sm:$0xff] }
  0xc4   :  { %v541_v32 = vld [vmem:[#allocation13 + $0x38] sm:$0xff]  ;;  %v1534_v35 = vpack.c.bf16 %v536_v29, %v534_v28  ;;  %v538_v38 = vld [vmem:[#allocation13 + $0x20] sm:$0xff]  ;;  %v540_v39 = vld [vmem:[#allocation13 + $0x30] sm:$0xff] }
  0xc5   :  { %v1536_v37 = vpack.c.bf16 %v541_v32, %v539_v31  ;;  %v543_v40 = vld [vmem:[#allocation13 + $0x48] sm:$0xff]  ;;  %v545_v41 = vld [vmem:[#allocation13 + $0x58] sm:$0xff]  ;;  %v1538_v42 = vpack.c.bf16 %v540_v39, %v538_v38  ;;  %v542_v44 = vld [vmem:[#allocation13 + $0x40] sm:$0xff] }
  0xc6   :  { %1511 = vmatpush1.bf16.msra.mxu1 %v1510_v50  ;;  %v1540_v43 = vpack.c.bf16 %v545_v41, %v543_v40  ;;  %v544_v45 = vld [vmem:[#allocation13 + $0x50] sm:$0xff]  ;;  %v547_v46 = vld [vmem:[#allocation13 + $0x68] sm:$0xff]  ;;  %v549_v47 = vld [vmem:[#allocation13 + $0x78] sm:$0xff] }
  0xc7   :  { %1513 = vmatprep.subr.bf16.mxu1 %v1512_v51  ;;  %v1542_v48 = vpack.c.bf16 %v544_v45, %v542_v44  ;;  %v1544_v49 = vpack.c.bf16 %v549_v47, %v547_v46  ;;  %v546_v50 = vld [vmem:[#allocation13 + $0x60] sm:$0xff]  ;;  %v548_v51 = vld [vmem:[#allocation13 + $0x70] sm:$0xff]  ;;  %v551_v52 = vld [vmem:[#allocation13 + $0x88] sm:$0xff] }
  0xc8   :  { %v553_v53 = vld [vmem:[#allocation13 + $0x98] sm:$0xff]  ;;  %v1546_v54 = vpack.c.bf16 %v548_v51, %v546_v50  ;;  %v555_v58 = vld [vmem:[#allocation13 + $0xa8] sm:$0xff]  ;;  %v576_v31 = vld [vmem:[#allocation13 + $0x150] sm:$0xff] }
  0xc9   :  { %v1548_v55 = vpack.c.bf16 %v553_v53, %v551_v52  ;;  %v557_v59 = vld [vmem:[#allocation13 + $0xb8] sm:$0xff]  ;;  %v563_v6 = vld [vmem:[#allocation13 + $0xe8] sm:$0xff] }
  0xca   :  { %1515 = vmatpush1.bf16.msra.mxu1 %v1514_v56  ;;  %v550_v56 = vld [vmem:[#allocation13 + $0x80] sm:$0xff]  ;;  %v1552_v61 = vpack.c.bf16 %v557_v59, %v555_v58  ;;  %v565_v7 = vld [vmem:[#allocation13 + $0xf8] sm:$0xff]  ;;  %v579_v32 = vld [vmem:[#allocation13 + $0x168] sm:$0xff] }
  0xcb   :  { %1517 = vmatprep.subr.bf16.mxu1 %v1516_v57  ;;  %v552_v57 = vld [vmem:[#allocation13 + $0x90] sm:$0xff]  ;;  %v1560_v9 = vpack.c.bf16 %v565_v7, %v563_v6  ;;  %v583_v38 = vld [vmem:[#allocation13 + $0x188] sm:$0xff]  ;;  %v585_v39 = vld [vmem:[#allocation13 + $0x198] sm:$0xff] }
  0xcc   :  { %v1550_v60 = vpack.c.bf16 %v552_v57, %v550_v56  ;;  %v1580_v41 = vpack.c.bf16 %v585_v39, %v583_v38  ;;  %v587_v44 = vld [vmem:[#allocation13 + $0x1a8] sm:$0xff]  ;;  %v589_v45 = vld [vmem:[#allocation13 + $0x1b8] sm:$0xff]  ;;  %v695_v38 = vld [vmem:[#allocation14 + $0x80] sm:$0xff] }
  0xcd   :  { %v1584_v47 = vpack.c.bf16 %v589_v45, %v587_v44  ;;  %v591_v50 = vld [vmem:[#allocation13 + $0x1c8] sm:$0xff]  ;;  %v593_v51 = vld [vmem:[#allocation13 + $0x1d8] sm:$0xff]  ;;  %v697_v39 = vld [vmem:[#allocation14 + $0x90] sm:$0xff] }
  0xce   :  { %1519 = vmatpush1.bf16.msra.mxu1 %v1518_v62  ;;  %v554_v62 = vld [vmem:[#allocation13 + $0xa0] sm:$0xff]  ;;  %v1588_v53 = vpack.c.bf16 %v593_v51, %v591_v50  ;;  %v595_v57 = vld [vmem:[#allocation13 + $0x1e8] sm:$0xff]  ;;  %v597_v58 = vld [vmem:[#allocation13 + $0x1f8] sm:$0xff] }
  0xcf   :  { %1521 = vmatprep.subr.bf16.mxu1 %v1520_v63  ;;  %v556_v63 = vld [vmem:[#allocation13 + $0xb0] sm:$0xff]  ;;  %v1592_v59 = vpack.c.bf16 %v597_v58, %v595_v57  ;;  %v699_v44 = vld [vmem:[#allocation14 + $0xa0] sm:$0xff]  ;;  %v712_v58 = vld [vmem:[#allocation14 + $0x108] sm:$0xff] }
  0xd0   :  { %v701_v45 = vld [vmem:[#allocation14 + $0xb0] sm:$0xff]  ;;  %v703_v50 = vld [vmem:[#allocation14 + $0xc0] sm:$0xff] }
  0xd1   :  { %v705_v51 = vld [vmem:[#allocation14 + $0xd0] sm:$0xff] }
  0xd2   :  { %v709_v57 = vld [vmem:[#allocation14 + $0xf0] sm:$0xff] }
 0x18a   :  { %v246_v17 = vpop.f32.mrb[0].mxu0 }
 0x18b   :  { %v247_v18 = vadd.f32 %v246_v17, %v175_v14  ;;  %v1451_v19 = vpop.f32.mrb[1].mxu0  ;;  %v450_v17 = vld [vmem:[#allocation11 + $0xe8] sm:$0xff] }
 0x18d   :  { %v250_v21 = vmax.f32 %v247_v18, 0.0  ;;  %v452_v18 = vld [vmem:[#allocation11 + $0xf8] sm:$0xff] }
 0x18e   :  { %v1528_v19 = vpack.c.bf16 %v452_v18, %v450_v17  ;;  %v566_v18 = vld [vmem:[#allocation13 + $0x100] sm:$0xff] }
 0x18f   :  { %1461 = vmatmul.mubr.msk.f32.vlgmr.msra.gmra.mrb[2].mxu0 %vm259_vm2, %v250_v21  ;;  %v451_v21 = vld [vmem:[#allocation11 + $0xf0] sm:$0xff] }
 0x190   :  { %1490 = vmatpush3.bf16.msra.mxu0 %v1489_v20  ;;  %1479 = vmatprep.mubr.msk.f32.mxu0 %vm2223_vm0, %v2222_v0  ;;  %v441_v0 = vld [vmem:[#allocation11 + $0xa0] sm:$0xff] }
 0x191   :  { %1491 = vmatprep.subr.bf16.mxu0 %v2224_v5  ;;  %v1522_v4 = vpack.c.bf16 %v443_v1, %v441_v0  ;;  %v449_v20 = vld [vmem:[#allocation11 + $0xe0] sm:$0xff]  ;;  %v559_v0 = vld [vmem:[#allocation13 + $0xc8] sm:$0xff]  ;;  %v561_v1 = vld [vmem:[#allocation13 + $0xd8] sm:$0xff] }
 0x192   :  { %v1530_v22 = vpack.c.bf16 %v451_v21, %v449_v20  ;;  %v571_v20 = vld [vmem:[#allocation13 + $0x128] sm:$0xff]  ;;  %v573_v21 = vld [vmem:[#allocation13 + $0x138] sm:$0xff] }
 0x193   :  { %1523 = vmatpush1.bf16.msra.mxu1 %v1522_v4  ;;  %v558_v4 = vld [vmem:[#allocation13 + $0xc0] sm:$0xff] }
 0x194   :  { %1493 = vmatpush3.bf16.msra.mxu0 %v1492_v24  ;;  %v537_v24 = vld [vmem:[#allocation13 + $0x18] sm:$0xff] }
 0x195   :  { %1494 = vmatprep.subr.bf16.mxu0 %v2224_v5  ;;  %v1532_v25 = vpack.c.bf16 %v537_v24, %v535_v23  ;;  %v1568_v23 = vpack.c.bf16 %v573_v21, %v571_v20  ;;  %v570_v24 = vld [vmem:[#allocation13 + $0x120] sm:$0xff]  ;;  %v685_v21 = vld [vmem:[#allocation14 + $0x30] sm:$0xff] }
 0x196   :  { %v683_v20 = vld [vmem:[#allocation14 + $0x20] sm:$0xff] }
 0x198   :  { %1496 = vmatpush3.bf16.msra.mxu0 %v1495_v27  ;;  %v345_v27 = vrot.slane %v2431_v13, %v344_v26  ;;  %v575_v26 = vld [vmem:[#allocation13 + $0x148] sm:$0xff] }
 0x199   :  { %1497 = vmatprep.subr.bf16.mxu0 %v2224_v5  ;;  %v1524_v5 = vpack.c.bf16 %v448_v3, %v446_v2  ;;  %v1554_v2 = vpack.c.bf16 %v556_v63, %v554_v62  ;;  %v1556_v3 = vpack.c.bf16 %v561_v1, %v559_v0  ;;  %v680_v63 = vld [vmem:[#allocation14 + $0x8] sm:$0xff]  ;;  %v682_v0 = vld [vmem:[#allocation14 + $0x18] sm:$0xff] }
 0x19a   :  { %v1596_v1 = vpack.c.bf16 %v682_v0, %v680_v63  ;;  %v713_v63 = vld [vmem:[#allocation14 + $0x110] sm:$0xff]  ;;  %v716_v0 = vld [vmem:[#allocation14 + $0x128] sm:$0xff] }
 0x19b   :  { %1525 = vmatprep.subr.bf16.mxu1 %v1524_v5  ;;  %v560_v5 = vld [vmem:[#allocation13 + $0xd0] sm:$0xff] }
 0x19c   :  { %1499 = vmatpush3.bf16.msra.mxu0 %v1498_v30  ;;  %1527 = vmatpush1.bf16.msra.mxu1 %v1526_v8  ;;  %v1558_v8 = vpack.c.bf16 %v560_v5, %v558_v4 }
 0x19d   :  { %1529 = vmatprep.subr.bf16.mxu1 %v1528_v19  ;;  %v568_v19 = vld [vmem:[#allocation13 + $0x110] sm:$0xff] }
 0x1a0   :  { %1531 = vmatpush1.bf16.msra.mxu1 %v1530_v22  ;;  %v1566_v22 = vpack.c.bf16 %v568_v19, %v566_v18 }
 0x1a1   :  { %1533 = vmatprep.subr.bf16.mxu1 %v1532_v25  ;;  %v572_v25 = vld [vmem:[#allocation13 + $0x130] sm:$0xff] }
 0x1a2   :  { %v1570_v28 = vpack.c.bf16 %v572_v25, %v570_v24  ;;  %v1602_v24 = vpack.c.bf16 %v685_v21, %v683_v20  ;;  %v725_v20 = vld [vmem:[#allocation14 + $0x170] sm:$0xff]  ;;  %v728_v21 = vld [vmem:[#allocation14 + $0x188] sm:$0xff] }
 0x262   :  { %v329_v12 = vpop.f32.mrb[2].mxu0 }
 0x263   :  { %v330_v14 = vadd.f32 %v329_v12, %v258_v10  ;;  %v1462_v15 = vpop.f32.mrb[3].mxu0  ;;  %v562_v10 = vld [vmem:[#allocation13 + $0xe0] sm:$0xff]  ;;  %v564_v12 = vld [vmem:[#allocation13 + $0xf0] sm:$0xff] }
 0x264   :  { %v569_v15 = vld [vmem:[#allocation13 + $0x118] sm:$0xff] }
 0x265   :  { %v333_v16 = vmax.f32 %v330_v14, 0.0  ;;  %v567_v14 = vld [vmem:[#allocation13 + $0x108] sm:$0xff] }
 0x266   :  { %v1564_v17 = vpack.c.bf16 %v569_v15, %v567_v14  ;;  %v684_v14 = vld [vmem:[#allocation14 + $0x28] sm:$0xff]  ;;  %v686_v15 = vld [vmem:[#allocation14 + $0x38] sm:$0xff] }
 0x267   :  { %1480 = vmatmul.mubr.msk.f32.vlgmr.msra.gmra.mrb[4].mxu0 %vm346_vm3, %v333_v16  ;;  %v1562_v16 = vpack.c.bf16 %v564_v12, %v562_v10  ;;  %v681_v10 = vld [vmem:[#allocation14 + $0x10] sm:$0xff]  ;;  %v1600_v19 = vpack.c.bf16 %v686_v15, %v684_v14  ;;  %v724_v15 = vld [vmem:[#allocation14 + $0x168] sm:$0xff] }
 0x268   :  { %v721_v14 = vld [vmem:[#allocation14 + $0x150] sm:$0xff] }
 0x33a   :  { %v416_v30 = vpop.f32.mrb[4].mxu0 }
 0x33b   :  { %v417_v33 = vadd.f32 %v416_v30, %v345_v27  ;;  %v1481_v34 = vpop.f32.mrb[5].mxu0  ;;  %v577_v27 = vld [vmem:[#allocation13 + $0x158] sm:$0xff]  ;;  %v574_v30 = vld [vmem:[#allocation13 + $0x140] sm:$0xff] }
 0x33c   :  { %v1572_v29 = vpack.c.bf16 %v577_v27, %v575_v26  ;;  %v1574_v34 = vpack.c.bf16 %v576_v31, %v574_v30  ;;  %v687_v26 = vld [vmem:[#allocation14 + $0x40] sm:$0xff]  ;;  %v689_v27 = vld [vmem:[#allocation14 + $0x50] sm:$0xff] }
 0x33d   :  { %v420_v36 = vmax.f32 %v417_v33, 0.0  ;;  %v581_v33 = vld [vmem:[#allocation13 + $0x178] sm:$0xff]  ;;  %v1606_v30 = vpack.c.bf16 %v689_v27, %v687_v26  ;;  %v729_v26 = vld [vmem:[#allocation14 + $0x190] sm:$0xff]  ;;  %v732_v27 = vld [vmem:[#allocation14 + $0x1a8] sm:$0xff] }
 0x33f   :  { %526 = vmatmul.mubr.f32.vlgmr.msra.gmra.mrb[0].mxu1 %v420_v36  ;;  %v578_v36 = vld [vmem:[#allocation13 + $0x160] sm:$0xff] }
 0x340   :  { %1535 = vmatpush1.bf16.msra.mxu1 %v1534_v35  ;;  %v1576_v35 = vpack.c.bf16 %v581_v33, %v579_v32  ;;  %v691_v32 = vld [vmem:[#allocation14 + $0x60] sm:$0xff]  ;;  %v693_v33 = vld [vmem:[#allocation14 + $0x70] sm:$0xff] }
 0x341   :  { %1537 = vmatprep.subr.bf16.mxu1 %v1536_v37  ;;  %v580_v37 = vld [vmem:[#allocation13 + $0x170] sm:$0xff] }
 0x342   :  { %v1578_v40 = vpack.c.bf16 %v580_v37, %v578_v36  ;;  %v1610_v36 = vpack.c.bf16 %v693_v33, %v691_v32  ;;  %v733_v32 = vld [vmem:[#allocation14 + $0x1b0] sm:$0xff]  ;;  %v736_v33 = vld [vmem:[#allocation14 + $0x1c8] sm:$0xff] }
 0x344   :  { %1539 = vmatpush1.bf16.msra.mxu1 %v1538_v42  ;;  %v582_v42 = vld [vmem:[#allocation13 + $0x180] sm:$0xff] }
 0x345   :  { %1541 = vmatprep.subr.bf16.mxu1 %v1540_v43  ;;  %v584_v43 = vld [vmem:[#allocation13 + $0x190] sm:$0xff] }
 0x346   :  { %v1582_v46 = vpack.c.bf16 %v584_v43, %v582_v42  ;;  %v1614_v42 = vpack.c.bf16 %v697_v39, %v695_v38  ;;  %v737_v38 = vld [vmem:[#allocation14 + $0x1d0] sm:$0xff] }
 0x348   :  { %1543 = vmatpush1.bf16.msra.mxu1 %v1542_v48  ;;  %v586_v48 = vld [vmem:[#allocation13 + $0x1a0] sm:$0xff] }
 0x349   :  { %1545 = vmatprep.subr.bf16.mxu1 %v1544_v49  ;;  %v588_v49 = vld [vmem:[#allocation13 + $0x1b0] sm:$0xff] }
 0x34a   :  { %v1586_v52 = vpack.c.bf16 %v588_v49, %v586_v48  ;;  %v1618_v48 = vpack.c.bf16 %v701_v45, %v699_v44  ;;  %v741_v44 = vld [vmem:[#allocation14 + $0x1f0] sm:$0xff] }
 0x34c   :  { %1547 = vmatpush1.bf16.msra.mxu1 %v1546_v54  ;;  %v590_v54 = vld [vmem:[#allocation13 + $0x1c0] sm:$0xff] }
 0x34d   :  { %1549 = vmatprep.subr.bf16.mxu1 %v1548_v55  ;;  %v592_v55 = vld [vmem:[#allocation13 + $0x1d0] sm:$0xff] }
 0x34e   :  { %v1590_v56 = vpack.c.bf16 %v592_v55, %v590_v54  ;;  %v1622_v54 = vpack.c.bf16 %v705_v51, %v703_v50  ;;  %v831_v50 = vld [vmem:[#allocation16 + $0x38] sm:$0xff]  ;;  %v824_v51 = vld [vmem:[#allocation16] sm:$0xff] }
 0x350   :  { %1551 = vmatpush1.bf16.msra.mxu1 %v1550_v60  ;;  %v594_v60 = vld [vmem:[#allocation13 + $0x1e0] sm:$0xff] }
 0x351   :  { %1553 = vmatprep.subr.bf16.mxu1 %v1552_v61  ;;  %v596_v61 = vld [vmem:[#allocation13 + $0x1f0] sm:$0xff] }
 0x352   :  { %v1594_v62 = vpack.c.bf16 %v596_v61, %v594_v60 }
 0x354   :  { %1555 = vmatpush1.bf16.msra.mxu1 %v1554_v2  ;;  %v455_v2 = vsub.s32 3, %v2428_v11 }
 0x355   :  { %1557 = vmatprep.subr.bf16.mxu1 %v1556_v3  ;;  %v2440_v3 = vld [vmem:[#allocation5 + $0x8] sm:$0xff] }
 0x356   :  { %v456_v4 = vrot.slane %v2431_v13, %v455_v2  ;;  %v460_v5 = vrot.slane %v2440_v3, %v455_v2 }
 0x358   :  { %1559 = vmatpush1.bf16.msra.mxu1 %v1558_v8 }
 0x359   :  { %1561 = vmatprep.subr.bf16.mxu1 %v1560_v9  ;;  %v679_v9 = vld [vmem:[#allocation14] sm:$0xff] }
 0x35c   :  { %1563 = vmatpush1.bf16.msra.mxu1 %v1562_v16 }
 0x35d   :  { %1565 = vmatprep.subr.bf16.mxu1 %v1564_v17  ;;  %v1598_v17 = vpack.c.bf16 %v681_v10, %v679_v9 }
 0x360   :  { %1567 = vmatpush1.bf16.msra.mxu1 %v1566_v22  ;;  %v688_v22 = vld [vmem:[#allocation14 + $0x48] sm:$0xff] }
 0x361   :  { %1569 = vmatprep.subr.bf16.mxu1 %v1568_v23  ;;  %v690_v23 = vld [vmem:[#allocation14 + $0x58] sm:$0xff] }
 0x362   :  { %v1604_v25 = vpack.c.bf16 %v690_v23, %v688_v22  ;;  %v730_v22 = vld [vmem:[#allocation14 + $0x198] sm:$0xff] }
 0x364   :  { %1571 = vmatpush1.bf16.msra.mxu1 %v1570_v28  ;;  %v692_v28 = vld [vmem:[#allocation14 + $0x68] sm:$0xff] }
 0x365   :  { %1573 = vmatprep.subr.bf16.mxu1 %v1572_v29  ;;  %v694_v29 = vld [vmem:[#allocation14 + $0x78] sm:$0xff] }
 0x366   :  { %v1608_v31 = vpack.c.bf16 %v694_v29, %v692_v28  ;;  %v734_v28 = vld [vmem:[#allocation14 + $0x1b8] sm:$0xff] }
 0x368   :  { %1575 = vmatpush1.bf16.msra.mxu1 %v1574_v34  ;;  %v696_v34 = vld [vmem:[#allocation14 + $0x88] sm:$0xff] }
 0x369   :  { %1577 = vmatprep.subr.bf16.mxu1 %v1576_v35  ;;  %v698_v35 = vld [vmem:[#allocation14 + $0x98] sm:$0xff] }
 0x36a   :  { %v1612_v37 = vpack.c.bf16 %v698_v35, %v696_v34  ;;  %v738_v34 = vld [vmem:[#allocation14 + $0x1d8] sm:$0xff] }
 0x36c   :  { %1579 = vmatpush1.bf16.msra.mxu1 %v1578_v40  ;;  %v700_v40 = vld [vmem:[#allocation14 + $0xa8] sm:$0xff] }
 0x36d   :  { %1581 = vmatprep.subr.bf16.mxu1 %v1580_v41  ;;  %v702_v41 = vld [vmem:[#allocation14 + $0xb8] sm:$0xff] }
 0x36e   :  { %v1616_v43 = vpack.c.bf16 %v702_v41, %v700_v40  ;;  %v740_v40 = vld [vmem:[#allocation14 + $0x1e8] sm:$0xff]  ;;  %v742_v41 = vld [vmem:[#allocation14 + $0x1f8] sm:$0xff] }
 0x370   :  { %1583 = vmatpush1.bf16.msra.mxu1 %v1582_v46  ;;  %v704_v46 = vld [vmem:[#allocation14 + $0xc8] sm:$0xff] }
 0x371   :  { %1585 = vmatprep.subr.bf16.mxu1 %v1584_v47  ;;  %v706_v47 = vld [vmem:[#allocation14 + $0xd8] sm:$0xff] }
 0x372   :  { %v1620_v49 = vpack.c.bf16 %v706_v47, %v704_v46  ;;  %v825_v46 = vld [vmem:[#allocation16 + $0x8] sm:$0xff] }
 0x373   :  { %v829_v47 = vld [vmem:[#allocation16 + $0x28] sm:$0xff] }
 0x374   :  { %1587 = vmatpush1.bf16.msra.mxu1 %v1586_v52  ;;  %v708_v52 = vld [vmem:[#allocation14 + $0xe8] sm:$0xff] }
 0x375   :  { %1589 = vmatprep.subr.bf16.mxu1 %v1588_v53  ;;  %v710_v53 = vld [vmem:[#allocation14 + $0xf8] sm:$0xff] }
 0x376   :  { %v1624_v55 = vpack.c.bf16 %v710_v53, %v708_v52  ;;  %v828_v52 = vld [vmem:[#allocation16 + $0x20] sm:$0xff] }
 0x378   :  { %1591 = vmatpush1.bf16.msra.mxu1 %v1590_v56  ;;  %v707_v56 = vld [vmem:[#allocation14 + $0xe0] sm:$0xff] }
 0x379   :  { %1593 = vmatprep.subr.bf16.mxu1 %v1592_v59  ;;  %v714_v59 = vld [vmem:[#allocation14 + $0x118] sm:$0xff]  ;;  %v1626_v60 = vpack.c.bf16 %v709_v57, %v707_v56  ;;  %v837_v56 = vld [vmem:[#allocation16 + $0x68] sm:$0xff] }
 0x37a   :  { %v1628_v61 = vpack.c.bf16 %v714_v59, %v712_v58  ;;  %v832_v58 = vld [vmem:[#allocation16 + $0x40] sm:$0xff] }
 0x37b   :  { %v836_v59 = vld [vmem:[#allocation16 + $0x60] sm:$0xff] }
 0x37c   :  { %1595 = vmatpush1.bf16.msra.mxu1 %v1594_v62  ;;  %v711_v62 = vld [vmem:[#allocation14 + $0x100] sm:$0xff] }
 0x37d   :  { %1597 = vmatprep.subr.bf16.mxu1 %v1596_v1  ;;  %v718_v1 = vld [vmem:[#allocation14 + $0x138] sm:$0xff]  ;;  %v1630_v2 = vpack.c.bf16 %v713_v63, %v711_v62  ;;  %v845_v62 = vld [vmem:[#allocation16 + $0xa8] sm:$0xff] }
 0x412   :  { %v527_v6 = vpop.f32.mrb[0].mxu1 }
 0x413   :  { %v528_v7 = vadd.f32 %v527_v6, %v456_v4  ;;  %v529_v8 = vpop.f32.mrb[1].mxu1  ;;  %v1632_v4 = vpack.c.bf16 %v718_v1, %v716_v0  ;;  %v717_v6 = vld [vmem:[#allocation14 + $0x130] sm:$0xff]  ;;  %v840_v0 = vld [vmem:[#allocation16 + $0x80] sm:$0xff] }
 0x414   :  { %v530_v12 = vadd.f32 %v529_v8, %v460_v5  ;;  %v715_v5 = vld [vmem:[#allocation14 + $0x120] sm:$0xff]  ;;  %v722_v8 = vld [vmem:[#allocation14 + $0x158] sm:$0xff] }
 0x415   :  { %v532_v18 = vmax.f32 %v528_v7, 0.0  ;;  %v720_v7 = vld [vmem:[#allocation14 + $0x148] sm:$0xff]  ;;  %v1634_v9 = vpack.c.bf16 %v717_v6, %v715_v5  ;;  %v844_v1 = vld [vmem:[#allocation16 + $0xa0] sm:$0xff] }
 0x416   :  { %v533_v16 = vmax.f32 %v530_v12, 0.0  ;;  %v1636_v10 = vpack.c.bf16 %v722_v8, %v720_v7  ;;  %v719_v12 = vld [vmem:[#allocation14 + $0x140] sm:$0xff]  ;;  %v853_v5 = vld [vmem:[#allocation16 + $0xe8] sm:$0xff] }
 0x417   :  { %v848_v7 = vld [vmem:[#allocation16 + $0xc0] sm:$0xff] }
 0x418   :  { %670 = vmatprep.mubr.f32.mxu1 %v533_v16  ;;  %v726_v16 = vld [vmem:[#allocation14 + $0x178] sm:$0xff]  ;;  %v852_v8 = vld [vmem:[#allocation16 + $0xe0] sm:$0xff] }
 0x419   :  { %671 = vmatmul.mubr.f32.vlgmr.msra.gmra.mrb[2].mxu1 %v532_v18  ;;  %v1640_v18 = vpack.c.bf16 %v726_v16, %v724_v15  ;;  %v856_v15 = vld [vmem:[#allocation16 + $0x100] sm:$0xff] }
 0x41a   :  { %1599 = vmatpush1.bf16.msra.mxu1 %v1598_v17  ;;  %v1638_v17 = vpack.c.bf16 %v721_v14, %v719_v12  ;;  %v861_v12 = vld [vmem:[#allocation16 + $0x128] sm:$0xff]  ;;  %v860_v16 = vld [vmem:[#allocation16 + $0x120] sm:$0xff] }
 0x41b   :  { %1601 = vmatprep.subr.bf16.mxu1 %v1600_v19  ;;  %v723_v19 = vld [vmem:[#allocation14 + $0x160] sm:$0xff] }
 0x41c   :  { %v1642_v23 = vpack.c.bf16 %v725_v20, %v723_v19  ;;  %v869_v19 = vld [vmem:[#allocation16 + $0x168] sm:$0xff] }
 0x41e   :  { %1603 = vmatpush1.bf16.msra.mxu1 %v1602_v24  ;;  %v1644_v24 = vpack.c.bf16 %v730_v22, %v728_v21  ;;  %v864_v21 = vld [vmem:[#allocation16 + $0x140] sm:$0xff] }
 0x41f   :  { %1605 = vmatprep.subr.bf16.mxu1 %v1604_v25  ;;  %v727_v25 = vld [vmem:[#allocation14 + $0x180] sm:$0xff] }
 0x420   :  { %v1646_v29 = vpack.c.bf16 %v729_v26, %v727_v25  ;;  %v868_v22 = vld [vmem:[#allocation16 + $0x160] sm:$0xff]  ;;  %v877_v25 = vld [vmem:[#allocation16 + $0x1a8] sm:$0xff] }
 0x422   :  { %1607 = vmatpush1.bf16.msra.mxu1 %v1606_v30  ;;  %v1648_v30 = vpack.c.bf16 %v734_v28, %v732_v27  ;;  %v872_v27 = vld [vmem:[#allocation16 + $0x180] sm:$0xff] }
 0x423   :  { %1609 = vmatprep.subr.bf16.mxu1 %v1608_v31  ;;  %v731_v31 = vld [vmem:[#allocation14 + $0x1a0] sm:$0xff] }
 0x424   :  { %v1650_v35 = vpack.c.bf16 %v733_v32, %v731_v31  ;;  %v876_v28 = vld [vmem:[#allocation16 + $0x1a0] sm:$0xff]  ;;  %v885_v31 = vld [vmem:[#allocation16 + $0x1e8] sm:$0xff] }
 0x426   :  { %1611 = vmatpush1.bf16.msra.mxu1 %v1610_v36  ;;  %v1652_v36 = vpack.c.bf16 %v738_v34, %v736_v33  ;;  %v880_v33 = vld [vmem:[#allocation16 + $0x1c0] sm:$0xff] }
 0x427   :  { %1613 = vmatprep.subr.bf16.mxu1 %v1612_v37  ;;  %v735_v37 = vld [vmem:[#allocation14 + $0x1c0] sm:$0xff] }
 0x428   :  { %v1654_v39 = vpack.c.bf16 %v737_v38, %v735_v37  ;;  %v884_v34 = vld [vmem:[#allocation16 + $0x1e0] sm:$0xff]  ;;  %v893_v37 = vld [vmem:[#allocation16 + $0x228] sm:$0xff] }
 0x42a   :  { %1615 = vmatpush1.bf16.msra.mxu1 %v1614_v42  ;;  %v1656_v42 = vpack.c.bf16 %v742_v41, %v740_v40  ;;  %v892_v40 = vld [vmem:[#allocation16 + $0x220] sm:$0xff] }
 0x42b   :  { %1617 = vmatprep.subr.bf16.mxu1 %v1616_v43  ;;  %v739_v43 = vld [vmem:[#allocation14 + $0x1e0] sm:$0xff] }
 0x42c   :  { %v1658_v45 = vpack.c.bf16 %v741_v44, %v739_v43  ;;  %v901_v43 = vld [vmem:[#allocation16 + $0x268] sm:$0xff] }
 0x42e   :  { %1619 = vmatpush1.bf16.msra.mxu1 %v1618_v48  ;;  %v827_v48 = vld [vmem:[#allocation16 + $0x18] sm:$0xff] }
 0x42f   :  { %1621 = vmatprep.subr.bf16.mxu1 %v1620_v49  ;;  %v1660_v49 = vpack.c.bf16 %v829_v47, %v825_v46  ;;  %v1724_v53 = vpack.c.bf16 %v831_v50, %v827_v48  ;;  %v900_v46 = vld [vmem:[#allocation16 + $0x260] sm:$0xff]  ;;  %v905_v48 = vld [vmem:[#allocation16 + $0x288] sm:$0xff] }
 0x431   :  { %1661 = vmatprep.subr.bf16.mxu0 %v1660_v49  ;;  %v909_v49 = vld [vmem:[#allocation16 + $0x2a8] sm:$0xff] }
 0x432   :  { %1623 = vmatpush1.bf16.msra.mxu1 %v1622_v54  ;;  %v1662_v54 = vpack.c.bf16 %v828_v52, %v824_v51  ;;  %v1700_v50 = vpack.c.bf16 %v909_v49, %v905_v48  ;;  %v904_v51 = vld [vmem:[#allocation16 + $0x280] sm:$0xff]  ;;  %v867_v48 = vld [vmem:[#allocation16 + $0x158] sm:$0xff] }
 0x433   :  { %1625 = vmatprep.subr.bf16.mxu1 %v1624_v55  ;;  %v833_v55 = vld [vmem:[#allocation16 + $0x48] sm:$0xff]  ;;  %v908_v52 = vld [vmem:[#allocation16 + $0x2a0] sm:$0xff]  ;;  %v871_v49 = vld [vmem:[#allocation16 + $0x178] sm:$0xff] }
 0x434   :  { %1663 = vmatpush1.bf16.msra.mxu0 %v1662_v54  ;;  %v1664_v57 = vpack.c.bf16 %v837_v56, %v833_v55  ;;  %v913_v54 = vld [vmem:[#allocation16 + $0x2c8] sm:$0xff] }
 0x435   :  { %v917_v55 = vld [vmem:[#allocation16 + $0x2e8] sm:$0xff] }
 0x436   :  { %1627 = vmatpush1.bf16.msra.mxu1 %v1626_v60  ;;  %v1666_v60 = vpack.c.bf16 %v836_v59, %v832_v58  ;;  %1665 = vmatprep.subr.bf16.mxu0 %v1664_v57  ;;  %v1704_v56 = vpack.c.bf16 %v917_v55, %v913_v54  ;;  %v912_v57 = vld [vmem:[#allocation16 + $0x2c0] sm:$0xff]  ;;  %v875_v54 = vld [vmem:[#allocation16 + $0x198] sm:$0xff] }
 0x437   :  { %1629 = vmatprep.subr.bf16.mxu1 %v1628_v61  ;;  %v841_v61 = vld [vmem:[#allocation16 + $0x88] sm:$0xff]  ;;  %v916_v58 = vld [vmem:[#allocation16 + $0x2e0] sm:$0xff]  ;;  %v879_v55 = vld [vmem:[#allocation16 + $0x1b8] sm:$0xff] }
 0x438   :  { %v1668_v63 = vpack.c.bf16 %v845_v62, %v841_v61  ;;  %1667 = vmatpush1.bf16.msra.mxu0 %v1666_v60  ;;  %v1706_v59 = vpack.c.bf16 %v916_v58, %v912_v57  ;;  %v921_v60 = vld [vmem:[#allocation16 + $0x308] sm:$0xff]  ;;  %v1748_v57 = vpack.c.bf16 %v879_v55, %v875_v54  ;;  %v874_v58 = vld [vmem:[#allocation16 + $0x190] sm:$0xff]  ;;  %v951_v54 = vld [vmem:[#allocation16 + $0x3f8] sm:$0xff] }
 0x439   :  { %v925_v61 = vld [vmem:[#allocation16 + $0x328] sm:$0xff]  ;;  %v944_v55 = vld [vmem:[#allocation16 + $0x3c0] sm:$0xff] }
 0x43a   :  { %1631 = vmatpush1.bf16.msra.mxu1 %v1630_v2  ;;  %v1670_v2 = vpack.c.bf16 %v844_v1, %v840_v0  ;;  %1669 = vmatprep.subr.bf16.mxu0 %v1668_v63  ;;  %v1708_v62 = vpack.c.bf16 %v925_v61, %v921_v60  ;;  %v920_v63 = vld [vmem:[#allocation16 + $0x300] sm:$0xff]  ;;  %v883_v60 = vld [vmem:[#allocation16 + $0x1d8] sm:$0xff] }
 0x43b   :  { %1633 = vmatprep.subr.bf16.mxu1 %v1632_v4  ;;  %v849_v4 = vld [vmem:[#allocation16 + $0xc8] sm:$0xff]  ;;  %v924_v0 = vld [vmem:[#allocation16 + $0x320] sm:$0xff]  ;;  %v887_v61 = vld [vmem:[#allocation16 + $0x1f8] sm:$0xff] }
 0x43c   :  { %v1672_v6 = vpack.c.bf16 %v853_v5, %v849_v4  ;;  %1671 = vmatpush1.bf16.msra.mxu0 %v1670_v2  ;;  %v1710_v1 = vpack.c.bf16 %v924_v0, %v920_v63  ;;  %v929_v2 = vld [vmem:[#allocation16 + $0x348] sm:$0xff]  ;;  %v1752_v63 = vpack.c.bf16 %v887_v61, %v883_v60  ;;  %v882_v0 = vld [vmem:[#allocation16 + $0x1d0] sm:$0xff] }
 0x43d   :  { %v933_v4 = vld [vmem:[#allocation16 + $0x368] sm:$0xff]  ;;  %v950_v60 = vld [vmem:[#allocation16 + $0x3f0] sm:$0xff] }
 0x43e   :  { %1635 = vmatpush1.bf16.msra.mxu1 %v1634_v9  ;;  %v1674_v9 = vpack.c.bf16 %v852_v8, %v848_v7  ;;  %1673 = vmatprep.subr.bf16.mxu0 %v1672_v6  ;;  %v1712_v5 = vpack.c.bf16 %v933_v4, %v929_v2  ;;  %v928_v6 = vld [vmem:[#allocation16 + $0x340] sm:$0xff]  ;;  %v891_v2 = vld [vmem:[#allocation16 + $0x218] sm:$0xff] }
 0x43f   :  { %1637 = vmatprep.subr.bf16.mxu1 %v1636_v10  ;;  %v857_v10 = vld [vmem:[#allocation16 + $0x108] sm:$0xff]  ;;  %v932_v7 = vld [vmem:[#allocation16 + $0x360] sm:$0xff]  ;;  %v895_v4 = vld [vmem:[#allocation16 + $0x238] sm:$0xff] }
 0x440   :  { %v1676_v14 = vpack.c.bf16 %v861_v12, %v857_v10  ;;  %1675 = vmatpush1.bf16.msra.mxu0 %v1674_v9  ;;  %v1714_v8 = vpack.c.bf16 %v932_v7, %v928_v6  ;;  %v937_v9 = vld [vmem:[#allocation16 + $0x388] sm:$0xff]  ;;  %v1756_v6 = vpack.c.bf16 %v895_v4, %v891_v2  ;;  %v890_v7 = vld [vmem:[#allocation16 + $0x210] sm:$0xff]  ;;  %v2448_v2 = vld [vmem:[#allocation5] sm:$0xff] }
 0x441   :  { %v941_v10 = vld [vmem:[#allocation16 + $0x3a8] sm:$0xff] }
 0x442   :  { %1639 = vmatpush1.bf16.msra.mxu1 %v1638_v17  ;;  %v1678_v17 = vpack.c.bf16 %v860_v16, %v856_v15  ;;  %1677 = vmatprep.subr.bf16.mxu0 %v1676_v14  ;;  %v1716_v12 = vpack.c.bf16 %v941_v10, %v937_v9  ;;  %v600_v14 = vsub.s32 4, %v2428_v11  ;;  %v899_v9 = vld [vmem:[#allocation16 + $0x258] sm:$0xff] }
 0x443   :  { %1641 = vmatprep.subr.bf16.mxu1 %v1640_v18  ;;  %v865_v18 = vld [vmem:[#allocation16 + $0x148] sm:$0xff]  ;;  %v903_v10 = vld [vmem:[#allocation16 + $0x278] sm:$0xff] }
 0x444   :  { %v1680_v20 = vpack.c.bf16 %v869_v19, %v865_v18  ;;  %1679 = vmatpush1.bf16.msra.mxu0 %v1678_v17  ;;  %v601_v15 = vrot.slane %v2431_v13, %v600_v14  ;;  %v605_v16 = vrot.slane %v2440_v3, %v600_v14  ;;  %v1760_v14 = vpack.c.bf16 %v903_v10, %v899_v9  ;;  %v1114_v9 = vld [vmem:[#allocation17] sm:$0xff]  ;;  %v1116_v10 = vld [vmem:[#allocation17 + $0x10] sm:$0xff] }
 0x446   :  { %1643 = vmatpush1.bf16.msra.mxu1 %v1642_v23  ;;  %v1682_v23 = vpack.c.bf16 %v868_v22, %v864_v21  ;;  %1681 = vmatprep.subr.bf16.mxu0 %v1680_v20  ;;  %v826_v20 = vld [vmem:[#allocation16 + $0x10] sm:$0xff] }
 0x447   :  { %1645 = vmatprep.subr.bf16.mxu1 %v1644_v24  ;;  %v873_v24 = vld [vmem:[#allocation16 + $0x188] sm:$0xff]  ;;  %v830_v21 = vld [vmem:[#allocation16 + $0x30] sm:$0xff] }
 0x448   :  { %v1684_v26 = vpack.c.bf16 %v877_v25, %v873_v24  ;;  %1683 = vmatpush1.bf16.msra.mxu0 %v1682_v23  ;;  %v835_v23 = vld [vmem:[#allocation16 + $0x58] sm:$0xff] }
 0x449   :  { %v839_v24 = vld [vmem:[#allocation16 + $0x78] sm:$0xff] }
 0x44a   :  { %1647 = vmatpush1.bf16.msra.mxu1 %v1646_v29  ;;  %v1686_v29 = vpack.c.bf16 %v876_v28, %v872_v27  ;;  %1685 = vmatprep.subr.bf16.mxu0 %v1684_v26  ;;  %v1726_v26 = vpack.c.bf16 %v830_v21, %v826_v20  ;;  %v1728_v28 = vpack.c.bf16 %v839_v24, %v835_v23  ;;  %v906_v21 = vld [vmem:[#allocation16 + $0x290] sm:$0xff]  ;;  %v915_v23 = vld [vmem:[#allocation16 + $0x2d8] sm:$0xff] }
 0x44b   :  { %1649 = vmatprep.subr.bf16.mxu1 %v1648_v30  ;;  %v881_v30 = vld [vmem:[#allocation16 + $0x1c8] sm:$0xff]  ;;  %v919_v24 = vld [vmem:[#allocation16 + $0x2f8] sm:$0xff] }
 0x44c   :  { %v1688_v32 = vpack.c.bf16 %v885_v31, %v881_v30  ;;  %1687 = vmatpush1.bf16.msra.mxu0 %v1686_v29  ;;  %v834_v29 = vld [vmem:[#allocation16 + $0x50] sm:$0xff]  ;;  %v843_v31 = vld [vmem:[#allocation16 + $0x98] sm:$0xff] }
 0x44d   :  { %v838_v30 = vld [vmem:[#allocation16 + $0x70] sm:$0xff] }
 0x44e   :  { %1651 = vmatpush1.bf16.msra.mxu1 %v1650_v35  ;;  %v1690_v35 = vpack.c.bf16 %v884_v34, %v880_v33  ;;  %1689 = vmatprep.subr.bf16.mxu0 %v1688_v32  ;;  %v847_v32 = vld [vmem:[#allocation16 + $0xb8] sm:$0xff]  ;;  %v1730_v13 = vpack.c.bf16 %v838_v30, %v834_v29  ;;  %v842_v34 = vld [vmem:[#allocation16 + $0x90] sm:$0xff] }
 0x44f   :  { %1653 = vmatprep.subr.bf16.mxu1 %v1652_v36  ;;  %v889_v36 = vld [vmem:[#allocation16 + $0x208] sm:$0xff]  ;;  %v1732_v33 = vpack.c.bf16 %v847_v32, %v843_v31  ;;  %v923_v29 = vld [vmem:[#allocation16 + $0x318] sm:$0xff] }
 0x450   :  { %v1692_v38 = vpack.c.bf16 %v893_v37, %v889_v36  ;;  %1691 = vmatpush1.bf16.msra.mxu0 %v1690_v35  ;;  %v846_v35 = vld [vmem:[#allocation16 + $0xb0] sm:$0xff]  ;;  %v851_v36 = vld [vmem:[#allocation16 + $0xd8] sm:$0xff] }
 0x451   :  { %v855_v37 = vld [vmem:[#allocation16 + $0xf8] sm:$0xff] }
 0x452   :  { %1655 = vmatpush1.bf16.msra.mxu1 %v1654_v39  ;;  %v888_v39 = vld [vmem:[#allocation16 + $0x200] sm:$0xff]  ;;  %1693 = vmatprep.subr.bf16.mxu0 %v1692_v38  ;;  %v1734_v38 = vpack.c.bf16 %v846_v35, %v842_v34  ;;  %v927_v30 = vld [vmem:[#allocation16 + $0x338] sm:$0xff] }
 0x453   :  { %1657 = vmatprep.subr.bf16.mxu1 %v1656_v42  ;;  %v1694_v41 = vpack.c.bf16 %v892_v40, %v888_v39  ;;  %v897_v42 = vld [vmem:[#allocation16 + $0x248] sm:$0xff]  ;;  %v1736_v39 = vpack.c.bf16 %v855_v37, %v851_v36  ;;  %v850_v40 = vld [vmem:[#allocation16 + $0xd0] sm:$0xff]  ;;  %v1772_v32 = vpack.c.bf16 %v927_v30, %v923_v29  ;;  %v931_v34 = vld [vmem:[#allocation16 + $0x358] sm:$0xff] }
 0x454   :  { %v1696_v44 = vpack.c.bf16 %v901_v43, %v897_v42  ;;  %v859_v42 = vld [vmem:[#allocation16 + $0x118] sm:$0xff] }
 0x455   :  { %1695 = vmatpush1.bf16.msra.mxu0 %v1694_v41  ;;  %v854_v41 = vld [vmem:[#allocation16 + $0xf0] sm:$0xff]  ;;  %v863_v43 = vld [vmem:[#allocation16 + $0x138] sm:$0xff] }
 0x456   :  { %1659 = vmatpush1.bf16.msra.mxu1 %v1658_v45  ;;  %v896_v45 = vld [vmem:[#allocation16 + $0x240] sm:$0xff]  ;;  %1697 = vmatprep.subr.bf16.mxu0 %v1696_v44  ;;  %v1738_v44 = vpack.c.bf16 %v854_v41, %v850_v40  ;;  %v935_v35 = vld [vmem:[#allocation16 + $0x378] sm:$0xff] }
 0x457   :  { %1725 = vmatprep.subr.bf16.mxu1 %v1724_v53  ;;  %v1698_v47 = vpack.c.bf16 %v900_v46, %v896_v45  ;;  %v1702_v53 = vpack.c.bf16 %v908_v52, %v904_v51  ;;  %v1740_v45 = vpack.c.bf16 %v863_v43, %v859_v42  ;;  %v858_v46 = vld [vmem:[#allocation16 + $0x110] sm:$0xff]  ;;  %v1744_v51 = vpack.c.bf16 %v871_v49, %v867_v48  ;;  %v939_v40 = vld [vmem:[#allocation16 + $0x398] sm:$0xff] }
 0x458   :  { %v866_v52 = vld [vmem:[#allocation16 + $0x150] sm:$0xff]  ;;  %v1776_v37 = vpack.c.bf16 %v935_v35, %v931_v34  ;;  %v943_v41 = vld [vmem:[#allocation16 + $0x3b8] sm:$0xff] }
 0x459   :  { %1699 = vmatpush1.bf16.msra.mxu0 %v1698_v47  ;;  %v862_v47 = vld [vmem:[#allocation16 + $0x130] sm:$0xff]  ;;  %v1780_v43 = vpack.c.bf16 %v943_v41, %v939_v40 }
 0x45a   :  { %1701 = vmatprep.subr.bf16.mxu0 %v1700_v50  ;;  %v1742_v50 = vpack.c.bf16 %v862_v47, %v858_v46  ;;  %v938_v46 = vld [vmem:[#allocation16 + $0x390] sm:$0xff] }
 0x45b   :  { %v942_v48 = vld [vmem:[#allocation16 + $0x3b0] sm:$0xff] }
 0x45c   :  { %v1782_v49 = vpack.c.bf16 %v942_v48, %v938_v46  ;;  %v1138_v48 = vld [vmem:[#allocation17 + $0xc0] sm:$0xff] }
 0x45d   :  { %1703 = vmatpush1.bf16.msra.mxu0 %v1702_v53  ;;  %v870_v53 = vld [vmem:[#allocation16 + $0x170] sm:$0xff] }
 0x45e   :  { %1705 = vmatprep.subr.bf16.mxu0 %v1704_v56  ;;  %v1746_v56 = vpack.c.bf16 %v870_v53, %v866_v52  ;;  %v947_v52 = vld [vmem:[#allocation16 + $0x3d8] sm:$0xff] }
 0x461   :  { %1707 = vmatpush1.bf16.msra.mxu0 %v1706_v59  ;;  %v878_v59 = vld [vmem:[#allocation16 + $0x1b0] sm:$0xff] }
 0x462   :  { %1709 = vmatprep.subr.bf16.mxu0 %v1708_v62  ;;  %v1750_v62 = vpack.c.bf16 %v878_v59, %v874_v58  ;;  %v946_v59 = vld [vmem:[#allocation16 + $0x3d0] sm:$0xff] }
 0x463   :  { %v1786_v61 = vpack.c.bf16 %v950_v60, %v946_v59  ;;  %v1146_v60 = vld [vmem:[#allocation17 + $0x100] sm:$0xff] }
 0x465   :  { %1711 = vmatpush1.bf16.msra.mxu0 %v1710_v1  ;;  %v886_v1 = vld [vmem:[#allocation16 + $0x1f0] sm:$0xff] }
 0x466   :  { %1713 = vmatprep.subr.bf16.mxu0 %v1712_v5  ;;  %v1754_v5 = vpack.c.bf16 %v886_v1, %v882_v0  ;;  %v745_v1 = vsub.s32 5, %v2428_v11 }
 0x468   :  { %v746_v4 = vrot.slane %v2448_v2, %v745_v1 }
 0x469   :  { %1715 = vmatpush1.bf16.msra.mxu0 %v1714_v8  ;;  %v894_v8 = vld [vmem:[#allocation16 + $0x230] sm:$0xff] }
 0x46a   :  { %1717 = vmatprep.subr.bf16.mxu0 %v1716_v12  ;;  %v1758_v12 = vpack.c.bf16 %v894_v8, %v890_v7 }
 0x4ec   :  { %v672_v17 = vpop.f32.mrb[2].mxu1 }
 0x4ed   :  { %v673_v18 = vadd.f32 %v672_v17, %v601_v15  ;;  %v674_v19 = vpop.f32.mrb[3].mxu1  ;;  %v898_v15 = vld [vmem:[#allocation16 + $0x250] sm:$0xff]  ;;  %v907_v17 = vld [vmem:[#allocation16 + $0x298] sm:$0xff] }
 0x4ee   :  { %v675_v22 = vadd.f32 %v674_v19, %v605_v16  ;;  %v902_v16 = vld [vmem:[#allocation16 + $0x270] sm:$0xff] }
 0x4ef   :  { %v677_v27 = vmax.f32 %v673_v18, 0.0  ;;  %v911_v18 = vld [vmem:[#allocation16 + $0x2b8] sm:$0xff]  ;;  %v1762_v19 = vpack.c.bf16 %v902_v16, %v898_v15 }
 0x4f0   :  { %v678_v25 = vmax.f32 %v675_v22, 0.0  ;;  %v1764_v20 = vpack.c.bf16 %v911_v18, %v907_v17  ;;  %v910_v22 = vld [vmem:[#allocation16 + $0x2b0] sm:$0xff]  ;;  %v1121_v15 = vld [vmem:[#allocation17 + $0x38] sm:$0xff]  ;;  %v1790_v17 = vpack.c.bf16 %v1116_v10, %v1114_v9  ;;  %v1154_v10 = vld [vmem:[#allocation17 + $0x140] sm:$0xff] }
 0x4f2   :  { %815 = vmatprep.mubr.f32.mxu1 %v678_v25  ;;  %v1766_v25 = vpack.c.bf16 %v910_v22, %v906_v21  ;;  %v1120_v21 = vld [vmem:[#allocation17 + $0x30] sm:$0xff]  ;;  %v1123_v22 = vld [vmem:[#allocation17 + $0x48] sm:$0xff] }
 0x4f3   :  { %816 = vmatmul.mubr.f32.vlgmr.msra.gmra.mrb[4].mxu1 %v677_v27  ;;  %v914_v27 = vld [vmem:[#allocation16 + $0x2d0] sm:$0xff] }
 0x4f4   :  { %1727 = vmatpush1.bf16.msra.mxu1 %v1726_v26  ;;  %v1768_v26 = vpack.c.bf16 %v919_v24, %v915_v23  ;;  %v1125_v23 = vld [vmem:[#allocation17 + $0x58] sm:$0xff] }
 0x4f5   :  { %1729 = vmatprep.subr.bf16.mxu1 %v1728_v28  ;;  %v918_v28 = vld [vmem:[#allocation16 + $0x2f0] sm:$0xff]  ;;  %v1796_v24 = vpack.c.bf16 %v1125_v23, %v1123_v22 }
 0x4f6   :  { %v1770_v31 = vpack.c.bf16 %v918_v28, %v914_v27  ;;  %v1127_v27 = vld [vmem:[#allocation17 + $0x68] sm:$0xff]  ;;  %v1129_v28 = vld [vmem:[#allocation17 + $0x78] sm:$0xff] }
 0x4f7   :  { %v1800_v30 = vpack.c.bf16 %v1129_v28, %v1127_v27 }
 0x4f8   :  { %1731 = vmatpush1.bf16.msra.mxu1 %v1730_v13  ;;  %v922_v13 = vld [vmem:[#allocation16 + $0x310] sm:$0xff] }
 0x4f9   :  { %1733 = vmatprep.subr.bf16.mxu1 %v1732_v33  ;;  %v926_v33 = vld [vmem:[#allocation16 + $0x330] sm:$0xff] }
 0x4fa   :  { %v1774_v36 = vpack.c.bf16 %v926_v33, %v922_v13  ;;  %v1131_v13 = vld [vmem:[#allocation17 + $0x88] sm:$0xff]  ;;  %v1133_v33 = vld [vmem:[#allocation17 + $0x98] sm:$0xff] }
 0x4fb   :  { %v1804_v35 = vpack.c.bf16 %v1133_v33, %v1131_v13 }
 0x4fc   :  { %1735 = vmatpush1.bf16.msra.mxu1 %v1734_v38  ;;  %v930_v38 = vld [vmem:[#allocation16 + $0x350] sm:$0xff] }
 0x4fd   :  { %1737 = vmatprep.subr.bf16.mxu1 %v1736_v39  ;;  %v934_v39 = vld [vmem:[#allocation16 + $0x370] sm:$0xff] }
 0x4fe   :  { %v1778_v42 = vpack.c.bf16 %v934_v39, %v930_v38  ;;  %v1135_v38 = vld [vmem:[#allocation17 + $0xa8] sm:$0xff]  ;;  %v1137_v39 = vld [vmem:[#allocation17 + $0xb8] sm:$0xff] }
 0x4ff   :  { %v1808_v41 = vpack.c.bf16 %v1137_v39, %v1135_v38  ;;  %v1177_v38 = vld [vmem:[#allocation17 + $0x1f8] sm:$0xff] }
 0x500   :  { %1739 = vmatpush1.bf16.msra.mxu1 %v1738_v44  ;;  %v936_v44 = vld [vmem:[#allocation16 + $0x380] sm:$0xff] }
 0x501   :  { %1741 = vmatprep.subr.bf16.mxu1 %v1740_v45  ;;  %v940_v45 = vld [vmem:[#allocation16 + $0x3a0] sm:$0xff] }
 0x502   :  { %v1718_v47 = vpack.c.bf16 %v940_v45, %v936_v44  ;;  %v1139_v44 = vld [vmem:[#allocation17 + $0xc8] sm:$0xff]  ;;  %v1141_v45 = vld [vmem:[#allocation17 + $0xd8] sm:$0xff] }
 0x504   :  { %1743 = vmatpush1.bf16.msra.mxu1 %v1742_v50  ;;  %1719 = vmatpush1.bf16.msra.mxu0 %v1718_v47  ;;  %v945_v50 = vld [vmem:[#allocation16 + $0x3c8] sm:$0xff]  ;;  %v1812_v47 = vpack.c.bf16 %v1141_v45, %v1139_v44  ;;  %v1181_v44 = vld [vmem:[#allocation17 + $0x218] sm:$0xff] }
 0x505   :  { %1745 = vmatprep.subr.bf16.mxu1 %v1744_v51  ;;  %v949_v51 = vld [vmem:[#allocation16 + $0x3e8] sm:$0xff] }
 0x506   :  { %v1720_v53 = vpack.c.bf16 %v949_v51, %v945_v50  ;;  %v1143_v50 = vld [vmem:[#allocation17 + $0xe8] sm:$0xff]  ;;  %v1145_v51 = vld [vmem:[#allocation17 + $0xf8] sm:$0xff] }
 0x508   :  { %1747 = vmatpush1.bf16.msra.mxu1 %v1746_v56  ;;  %v948_v56 = vld [vmem:[#allocation16 + $0x3e0] sm:$0xff]  ;;  %1721 = vmatprep.subr.bf16.mxu0 %v1720_v53  ;;  %v1816_v53 = vpack.c.bf16 %v1145_v51, %v1143_v50 }
 0x509   :  { %1749 = vmatprep.subr.bf16.mxu1 %v1748_v57  ;;  %v1784_v57 = vpack.c.bf16 %v951_v54, %v947_v52  ;;  %v1722_v58 = vpack.c.bf16 %v948_v56, %v944_v55  ;;  %v1142_v54 = vld [vmem:[#allocation17 + $0xe0] sm:$0xff]  ;;  %v1144_v55 = vld [vmem:[#allocation17 + $0xf0] sm:$0xff]  ;;  %v1147_v56 = vld [vmem:[#allocation17 + $0x108] sm:$0xff] }
 0x50b   :  { %1723 = vmatpush1.bf16.msra.mxu0 %v1722_v58  ;;  %v1818_v58 = vpack.c.bf16 %v1144_v55, %v1142_v54 }
 0x50c   :  { %1751 = vmatpush1.bf16.msra.mxu1 %v1750_v62  ;;  %v1115_v62 = vld [vmem:[#allocation17 + $0x8] sm:$0xff] }
 0x50d   :  { %1753 = vmatprep.subr.bf16.mxu1 %v1752_v63  ;;  %v1117_v63 = vld [vmem:[#allocation17 + $0x18] sm:$0xff] }
 0x50e   :  { %v1788_v0 = vpack.c.bf16 %v1117_v63, %v1115_v62  ;;  %v1151_v62 = vld [vmem:[#allocation17 + $0x128] sm:$0xff]  ;;  %v1153_v63 = vld [vmem:[#allocation17 + $0x138] sm:$0xff] }
 0x510   :  { %1755 = vmatpush1.bf16.msra.mxu1 %v1754_v5  ;;  %1789 = vmatprep.subr.bf16.mxu0 %v1788_v0  ;;  %v750_v5 = vrot.slane %v2440_v3, %v745_v1  ;;  %v1824_v1 = vpack.c.bf16 %v1153_v63, %v1151_v62  ;;  %v1185_v62 = vld [vmem:[#allocation17 + $0x238] sm:$0xff] }
 0x511   :  { %1757 = vmatprep.subr.bf16.mxu1 %v1756_v6 }
 0x514   :  { %1759 = vmatpush1.bf16.msra.mxu1 %v1758_v12 }
 0x515   :  { %1761 = vmatprep.subr.bf16.mxu1 %v1760_v14  ;;  %v1119_v14 = vld [vmem:[#allocation17 + $0x28] sm:$0xff] }
 0x518   :  { %1763 = vmatpush1.bf16.msra.mxu1 %v1762_v19  ;;  %v1792_v19 = vpack.c.bf16 %v1121_v15, %v1119_v14  ;;  %v1159_v14 = vld [vmem:[#allocation17 + $0x168] sm:$0xff]  ;;  %v1161_v15 = vld [vmem:[#allocation17 + $0x178] sm:$0xff] }
 0x519   :  { %1765 = vmatprep.subr.bf16.mxu1 %v1764_v20  ;;  %v1118_v20 = vld [vmem:[#allocation17 + $0x20] sm:$0xff] }
 0x51a   :  { %v1794_v3 = vpack.c.bf16 %v1120_v21, %v1118_v20  ;;  %v1163_v20 = vld [vmem:[#allocation17 + $0x188] sm:$0xff]  ;;  %v1165_v21 = vld [vmem:[#allocation17 + $0x198] sm:$0xff] }
 0x51b   :  { %v1836_v23 = vpack.c.bf16 %v1165_v21, %v1163_v20  ;;  %v1190_v20 = vld [vmem:[#allocation17 + $0x260] sm:$0xff]  ;;  %v1192_v21 = vld [vmem:[#allocation17 + $0x270] sm:$0xff] }
 0x51c   :  { %1767 = vmatpush1.bf16.msra.mxu1 %v1766_v25  ;;  %v1122_v25 = vld [vmem:[#allocation17 + $0x40] sm:$0xff] }
 0x51d   :  { %1769 = vmatprep.subr.bf16.mxu1 %v1768_v26  ;;  %v1124_v26 = vld [vmem:[#allocation17 + $0x50] sm:$0xff] }
 0x51e   :  { %v1798_v29 = vpack.c.bf16 %v1124_v26, %v1122_v25  ;;  %v1167_v25 = vld [vmem:[#allocation17 + $0x1a8] sm:$0xff]  ;;  %v1169_v26 = vld [vmem:[#allocation17 + $0x1b8] sm:$0xff] }
 0x51f   :  { %v1840_v28 = vpack.c.bf16 %v1169_v26, %v1167_v25  ;;  %v1194_v25 = vld [vmem:[#allocation17 + $0x280] sm:$0xff]  ;;  %v1196_v26 = vld [vmem:[#allocation17 + $0x290] sm:$0xff] }
 0x520   :  { %1771 = vmatpush1.bf16.msra.mxu1 %v1770_v31  ;;  %v1126_v31 = vld [vmem:[#allocation17 + $0x60] sm:$0xff] }
 0x521   :  { %1773 = vmatprep.subr.bf16.mxu1 %v1772_v32  ;;  %v1128_v32 = vld [vmem:[#allocation17 + $0x70] sm:$0xff] }
 0x522   :  { %v1802_v34 = vpack.c.bf16 %v1128_v32, %v1126_v31  ;;  %v1171_v31 = vld [vmem:[#allocation17 + $0x1c8] sm:$0xff]  ;;  %v1173_v32 = vld [vmem:[#allocation17 + $0x1d8] sm:$0xff] }
 0x523   :  { %v1844_v33 = vpack.c.bf16 %v1173_v32, %v1171_v31  ;;  %v1198_v31 = vld [vmem:[#allocation17 + $0x2a0] sm:$0xff]  ;;  %v1200_v32 = vld [vmem:[#allocation17 + $0x2b0] sm:$0xff] }
 0x524   :  { %1775 = vmatpush1.bf16.msra.mxu1 %v1774_v36  ;;  %v1130_v36 = vld [vmem:[#allocation17 + $0x80] sm:$0xff] }
 0x525   :  { %1777 = vmatprep.subr.bf16.mxu1 %v1776_v37  ;;  %v1132_v37 = vld [vmem:[#allocation17 + $0x90] sm:$0xff] }
 0x526   :  { %v1806_v40 = vpack.c.bf16 %v1132_v37, %v1130_v36  ;;  %v1175_v37 = vld [vmem:[#allocation17 + $0x1e8] sm:$0xff] }
 0x527   :  { %v1848_v39 = vpack.c.bf16 %v1177_v38, %v1175_v37  ;;  %v1204_v37 = vld [vmem:[#allocation17 + $0x2d0] sm:$0xff]  ;;  %v1207_v38 = vld [vmem:[#allocation17 + $0x2e8] sm:$0xff] }
 0x528   :  { %1779 = vmatpush1.bf16.msra.mxu1 %v1778_v42  ;;  %v1134_v42 = vld [vmem:[#allocation17 + $0xa0] sm:$0xff] }
 0x529   :  { %1781 = vmatprep.subr.bf16.mxu1 %v1780_v43  ;;  %v1136_v43 = vld [vmem:[#allocation17 + $0xb0] sm:$0xff] }
 0x52a   :  { %v1810_v46 = vpack.c.bf16 %v1136_v43, %v1134_v42  ;;  %v1179_v43 = vld [vmem:[#allocation17 + $0x208] sm:$0xff] }
 0x52b   :  { %v1852_v45 = vpack.c.bf16 %v1181_v44, %v1179_v43  ;;  %v1208_v43 = vld [vmem:[#allocation17 + $0x2f0] sm:$0xff]  ;;  %v1211_v44 = vld [vmem:[#allocation17 + $0x308] sm:$0xff] }
 0x52c   :  { %1783 = vmatpush1.bf16.msra.mxu1 %v1782_v49  ;;  %v1140_v49 = vld [vmem:[#allocation17 + $0xd0] sm:$0xff] }
 0x52d   :  { %1785 = vmatprep.subr.bf16.mxu1 %v1784_v57  ;;  %v1814_v52 = vpack.c.bf16 %v1140_v49, %v1138_v48  ;;  %v1149_v57 = vld [vmem:[#allocation17 + $0x118] sm:$0xff]  ;;  %v2457_v49 = vld [vmem:[#allocation5 + $0x8] sm:$0xff] }
 0x52e   :  { %v1820_v59 = vpack.c.bf16 %v1149_v57, %v1147_v56  ;;  %v1178_v57 = vld [vmem:[#allocation17 + $0x200] sm:$0xff] }
 0x530   :  { %1787 = vmatpush1.bf16.msra.mxu1 %v1786_v61  ;;  %v1148_v61 = vld [vmem:[#allocation17 + $0x110] sm:$0xff] }
 0x531   :  { %v1822_v0 = vpack.c.bf16 %v1148_v61, %v1146_v60  ;;  %v1183_v61 = vld [vmem:[#allocation17 + $0x228] sm:$0xff] }
 0x5c6   :  { %v817_v6 = vpop.f32.mrb[4].mxu1 }
 0x5c7   :  { %v818_v7 = vadd.f32 %v817_v6, %v746_v4  ;;  %v819_v8 = vpop.f32.mrb[5].mxu1  ;;  %v1150_v4 = vld [vmem:[#allocation17 + $0x120] sm:$0xff]  ;;  %v1155_v6 = vld [vmem:[#allocation17 + $0x148] sm:$0xff] }
 0x5c8   :  { %v820_v12 = vadd.f32 %v819_v8, %v750_v5  ;;  %v1152_v5 = vld [vmem:[#allocation17 + $0x130] sm:$0xff] }
 0x5c9   :  { %v822_v18 = vmax.f32 %v818_v7, 0.0  ;;  %v1157_v7 = vld [vmem:[#allocation17 + $0x158] sm:$0xff]  ;;  %v1826_v8 = vpack.c.bf16 %v1152_v5, %v1150_v4  ;;  %v1856_v4 = vpack.c.bf16 %v1185_v62, %v1183_v61  ;;  %v1182_v5 = vld [vmem:[#allocation17 + $0x220] sm:$0xff] }
 0x5ca   :  { %v823_v16 = vmax.f32 %v820_v12, 0.0  ;;  %v1828_v9 = vpack.c.bf16 %v1157_v7, %v1155_v6  ;;  %v1156_v12 = vld [vmem:[#allocation17 + $0x150] sm:$0xff] }
 0x5cb   :  { %v1184_v6 = vld [vmem:[#allocation17 + $0x230] sm:$0xff] }
 0x5cc   :  { %1032 = vmatprep.mubr.f32.mxu0 %v823_v16  ;;  %1103 = vmatprep.mubr.f32.mxu1 %v823_v16  ;;  %v1830_v16 = vpack.c.bf16 %v1156_v12, %v1154_v10  ;;  %v1858_v10 = vpack.c.bf16 %v1184_v6, %v1182_v5 }
 0x5cd   :  { %1033 = vmatmul.mubr.f32.vlgmr.msra.gmra.mrb[6].mxu0 %v822_v18  ;;  %1104 = vmatmul.mubr.f32.vlgmr.msra.gmra.mrb[6].mxu1 %v822_v18  ;;  %v1158_v18 = vld [vmem:[#allocation17 + $0x160] sm:$0xff] }
 0x5ce   :  { %1791 = vmatpush1.bf16.msra.mxu0 %v1790_v17  ;;  %v1832_v17 = vpack.c.bf16 %v1161_v15, %v1159_v14  ;;  %v1186_v14 = vld [vmem:[#allocation17 + $0x240] sm:$0xff]  ;;  %v1188_v15 = vld [vmem:[#allocation17 + $0x250] sm:$0xff] }
 0x5cf   :  { %1793 = vmatprep.subr.bf16.mxu0 %v1792_v19  ;;  %v1160_v19 = vld [vmem:[#allocation17 + $0x170] sm:$0xff] }
 0x5d0   :  { %v1834_v22 = vpack.c.bf16 %v1160_v19, %v1158_v18  ;;  %v1862_v18 = vpack.c.bf16 %v1188_v15, %v1186_v14  ;;  %v1226_v15 = vld [vmem:[#allocation17 + $0x380] sm:$0xff] }
 0x5d2   :  { %1795 = vmatpush1.bf16.msra.mxu0 %v1794_v3  ;;  %v1162_v3 = vld [vmem:[#allocation17 + $0x180] sm:$0xff] }
 0x5d3   :  { %1797 = vmatprep.subr.bf16.mxu0 %v1796_v24  ;;  %v1164_v24 = vld [vmem:[#allocation17 + $0x190] sm:$0xff] }
 0x5d4   :  { %v1838_v27 = vpack.c.bf16 %v1164_v24, %v1162_v3  ;;  %v1866_v3 = vpack.c.bf16 %v1192_v21, %v1190_v20  ;;  %v1230_v21 = vld [vmem:[#allocation17 + $0x3a0] sm:$0xff] }
 0x5d6   :  { %1799 = vmatpush1.bf16.msra.mxu0 %v1798_v29  ;;  %v1166_v29 = vld [vmem:[#allocation17 + $0x1a0] sm:$0xff] }
 0x5d7   :  { %1801 = vmatprep.subr.bf16.mxu0 %v1800_v30  ;;  %v1168_v30 = vld [vmem:[#allocation17 + $0x1b0] sm:$0xff] }
 0x5d8   :  { %v1842_v13 = vpack.c.bf16 %v1168_v30, %v1166_v29  ;;  %v1870_v29 = vpack.c.bf16 %v1196_v26, %v1194_v25  ;;  %v1234_v26 = vld [vmem:[#allocation17 + $0x3c0] sm:$0xff] }
 0x5da   :  { %1803 = vmatpush1.bf16.msra.mxu0 %v1802_v34  ;;  %v1170_v34 = vld [vmem:[#allocation17 + $0x1c0] sm:$0xff] }
 0x5db   :  { %1805 = vmatprep.subr.bf16.mxu0 %v1804_v35  ;;  %v1172_v35 = vld [vmem:[#allocation17 + $0x1d0] sm:$0xff] }
 0x5dc   :  { %v1846_v36 = vpack.c.bf16 %v1172_v35, %v1170_v34  ;;  %v1874_v34 = vpack.c.bf16 %v1200_v32, %v1198_v31 }
 0x5de   :  { %1807 = vmatpush1.bf16.msra.mxu0 %v1806_v40  ;;  %v1174_v40 = vld [vmem:[#allocation17 + $0x1e0] sm:$0xff] }
 0x5df   :  { %1809 = vmatprep.subr.bf16.mxu0 %v1808_v41  ;;  %v1176_v41 = vld [vmem:[#allocation17 + $0x1f0] sm:$0xff] }
 0x5e0   :  { %v1850_v42 = vpack.c.bf16 %v1176_v41, %v1174_v40 }
 0x5e2   :  { %1811 = vmatpush1.bf16.msra.mxu0 %v1810_v46  ;;  %v2453_v46 = vsub.s32 6, %v2428_v11 }
 0x5e3   :  { %1813 = vmatprep.subr.bf16.mxu0 %v1812_v47  ;;  %v169_v47 = vld [vmem:[#allocation5 + $0x18] sm:$0xff] }
 0x5e4   :  { %v955_v48 = vrot.slane %v2448_v2, %v2453_v46  ;;  %v959_v50 = vrot.slane %v2457_v49, %v2453_v46  ;;  %v967_v51 = vrot.slane %v169_v47, %v2453_v46 }
 0x5e6   :  { %1815 = vmatpush1.bf16.msra.mxu0 %v1814_v52 }
 0x5e7   :  { %1817 = vmatprep.subr.bf16.mxu0 %v1816_v53 }
 0x5ea   :  { %1819 = vmatpush1.bf16.msra.mxu0 %v1818_v58  ;;  %v1180_v58 = vld [vmem:[#allocation17 + $0x210] sm:$0xff] }
 0x5eb   :  { %1821 = vmatprep.subr.bf16.mxu0 %v1820_v59 }
 0x5ee   :  { %1823 = vmatpush1.bf16.msra.mxu0 %v1822_v0  ;;  %v1854_v0 = vpack.c.bf16 %v1180_v58, %v1178_v57  ;;  %v1214_v57 = vld [vmem:[#allocation17 + $0x320] sm:$0xff]  ;;  %v1216_v58 = vld [vmem:[#allocation17 + $0x330] sm:$0xff] }
 0x5ef   :  { %1825 = vmatprep.subr.bf16.mxu0 %v1824_v1  ;;  %v1890_v61 = vpack.c.bf16 %v1216_v58, %v1214_v57 }
 0x5f2   :  { %1827 = vmatpush1.bf16.msra.mxu0 %v1826_v8  ;;  %v1187_v8 = vld [vmem:[#allocation17 + $0x248] sm:$0xff] }
 0x5f3   :  { %1829 = vmatprep.subr.bf16.mxu0 %v1828_v9  ;;  %v1189_v9 = vld [vmem:[#allocation17 + $0x258] sm:$0xff] }
 0x5f4   :  { %v1860_v12 = vpack.c.bf16 %v1189_v9, %v1187_v8  ;;  %v1224_v8 = vld [vmem:[#allocation17 + $0x370] sm:$0xff]  ;;  %v1227_v9 = vld [vmem:[#allocation17 + $0x388] sm:$0xff] }
 0x5f6   :  { %1831 = vmatpush1.bf16.msra.mxu0 %v1830_v16  ;;  %v1191_v16 = vld [vmem:[#allocation17 + $0x268] sm:$0xff] }
 0x5f7   :  { %1833 = vmatprep.subr.bf16.mxu0 %v1832_v17  ;;  %v1193_v17 = vld [vmem:[#allocation17 + $0x278] sm:$0xff] }
 0x5f8   :  { %v1864_v19 = vpack.c.bf16 %v1193_v17, %v1191_v16  ;;  %v1228_v16 = vld [vmem:[#allocation17 + $0x390] sm:$0xff]  ;;  %v1231_v17 = vld [vmem:[#allocation17 + $0x3a8] sm:$0xff] }
 0x5fa   :  { %1835 = vmatpush1.bf16.msra.mxu0 %v1834_v22  ;;  %v1195_v22 = vld [vmem:[#allocation17 + $0x288] sm:$0xff] }
 0x5fb   :  { %1837 = vmatprep.subr.bf16.mxu0 %v1836_v23  ;;  %v1197_v23 = vld [vmem:[#allocation17 + $0x298] sm:$0xff] }
 0x5fc   :  { %v1868_v24 = vpack.c.bf16 %v1197_v23, %v1195_v22  ;;  %v1232_v22 = vld [vmem:[#allocation17 + $0x3b0] sm:$0xff]  ;;  %v1235_v23 = vld [vmem:[#allocation17 + $0x3c8] sm:$0xff] }
 0x5fe   :  { %1839 = vmatpush1.bf16.msra.mxu0 %v1838_v27  ;;  %v1199_v27 = vld [vmem:[#allocation17 + $0x2a8] sm:$0xff] }
 0x5ff   :  { %1841 = vmatprep.subr.bf16.mxu0 %v1840_v28  ;;  %v1201_v28 = vld [vmem:[#allocation17 + $0x2b8] sm:$0xff] }
 0x600   :  { %v1872_v30 = vpack.c.bf16 %v1201_v28, %v1199_v27  ;;  %v1236_v27 = vld [vmem:[#allocation17 + $0x3d0] sm:$0xff]  ;;  %v168_v28 = vld [vmem:[#allocation5 + $0x10] sm:$0xff] }
 0x601   :  { %v1910_v31 = vpack.c.bf16 %v1236_v27, %v1234_v26  ;;  %v963_v32 = vrot.slane %v168_v28, %v2453_v46 }
 0x602   :  { %1843 = vmatpush1.bf16.msra.mxu0 %v1842_v13  ;;  %v1203_v13 = vld [vmem:[#allocation17 + $0x2c8] sm:$0xff] }
 0x603   :  { %1845 = vmatprep.subr.bf16.mxu0 %v1844_v33  ;;  %v1205_v33 = vld [vmem:[#allocation17 + $0x2d8] sm:$0xff] }
 0x604   :  { %v1876_v35 = vpack.c.bf16 %v1205_v33, %v1203_v13  ;;  %v1238_v33 = vld [vmem:[#allocation17 + $0x3e0] sm:$0xff] }
 0x606   :  { %1847 = vmatpush1.bf16.msra.mxu0 %v1846_v36  ;;  %v1202_v36 = vld [vmem:[#allocation17 + $0x2c0] sm:$0xff] }
 0x607   :  { %1849 = vmatprep.subr.bf16.mxu0 %v1848_v39  ;;  %v1209_v39 = vld [vmem:[#allocation17 + $0x2f8] sm:$0xff]  ;;  %v1878_v40 = vpack.c.bf16 %v1204_v37, %v1202_v36 }
 0x608   :  { %v1880_v41 = vpack.c.bf16 %v1209_v39, %v1207_v38  ;;  %v1244_v38 = vsub.s32 7, %v2428_v11 }
 0x60a   :  { %1851 = vmatpush1.bf16.msra.mxu0 %v1850_v42  ;;  %v1206_v42 = vld [vmem:[#allocation17 + $0x2e0] sm:$0xff]  ;;  %v1245_v39 = vrot.slane %v2448_v2, %v1244_v38 }
 0x60b   :  { %1853 = vmatprep.subr.bf16.mxu0 %v1852_v45  ;;  %v1213_v45 = vld [vmem:[#allocation17 + $0x318] sm:$0xff]  ;;  %v1882_v47 = vpack.c.bf16 %v1208_v43, %v1206_v42 }
 0x6a0   :  { %v1034_v52 = vpop.f32.mrb[6].mxu0  ;;  %v2462_v53 = vpop.f32.mrb[6].mxu1 }
 0x6a1   :  { %v1035_v54 = vadd.f32 %v1034_v52, %v955_v48  ;;  %v1036_v55 = vpop.f32.mrb[7].mxu0  ;;  %v1107_v56 = vpop.f32.mrb[7].mxu1  ;;  %v1884_v48 = vpack.c.bf16 %v1213_v45, %v1211_v44  ;;  %v1215_v52 = vld [vmem:[#allocation17 + $0x328] sm:$0xff]  ;;  %v1106_v36 = vadd.f32 %v2462_v53, %v963_v32 }
 0x6a2   :  { %v1037_v59 = vadd.f32 %v1036_v55, %v959_v50  ;;  %v1108_v60 = vadd.f32 %v1107_v56, %v967_v51  ;;  %v1210_v50 = vld [vmem:[#allocation17 + $0x300] sm:$0xff]  ;;  %v1212_v51 = vld [vmem:[#allocation17 + $0x310] sm:$0xff] }
 0x6a3   :  { %v1110_v1 = vmax.f32 %v1035_v54, 0.0  ;;  %v1217_v54 = vld [vmem:[#allocation17 + $0x338] sm:$0xff]  ;;  %v1886_v55 = vpack.c.bf16 %v1212_v51, %v1210_v50  ;;  %v1112_v37 = vmax.f32 %v1106_v36, 0.0 }
 0x6a4   :  { %v1111_v63 = vmax.f32 %v1037_v59, 0.0  ;;  %v1113_v7 = vmax.f32 %v1108_v60, 0.0  ;;  %v1888_v56 = vpack.c.bf16 %v1217_v54, %v1215_v52  ;;  %v1219_v59 = vld [vmem:[#allocation17 + $0x348] sm:$0xff]  ;;  %v1221_v60 = vld [vmem:[#allocation17 + $0x358] sm:$0xff] }
 0x6a5   :  { %v1892_v62 = vpack.c.bf16 %v1221_v60, %v1219_v59 }
 0x6a6   :  { %1314 = vmatprep.mubr.f32.mxu0 %v1111_v63  ;;  %v1218_v63 = vld [vmem:[#allocation17 + $0x340] sm:$0xff] }
 0x6a7   :  { %1315 = vmatmul.mubr.f32.vlgmr.msra.gmra.mrb[8].mxu0 %v1110_v1  ;;  %v1223_v1 = vld [vmem:[#allocation17 + $0x368] sm:$0xff] }
 0x6a8   :  { %1855 = vmatpush1.bf16.msra.mxu0 %v1854_v0  ;;  %1385 = vmatprep.mubr.f32.mxu0 %v1113_v7  ;;  %v1220_v0 = vld [vmem:[#allocation17 + $0x350] sm:$0xff]  ;;  %v1222_v7 = vld [vmem:[#allocation17 + $0x360] sm:$0xff] }
 0x6a9   :  { %1857 = vmatprep.subr.bf16.mxu0 %v1856_v4  ;;  %v1225_v4 = vld [vmem:[#allocation17 + $0x378] sm:$0xff]  ;;  %v1894_v5 = vpack.c.bf16 %v1220_v0, %v1218_v63 }
 0x6aa   :  { %v1896_v6 = vpack.c.bf16 %v1225_v4, %v1223_v1 }
 0x6ac   :  { %1859 = vmatpush1.bf16.msra.mxu0 %v1858_v10  ;;  %v1229_v10 = vld [vmem:[#allocation17 + $0x398] sm:$0xff] }
 0x6ad   :  { %1861 = vmatprep.subr.bf16.mxu0 %v1860_v12  ;;  %v1898_v12 = vpack.c.bf16 %v1224_v8, %v1222_v7  ;;  %v1900_v14 = vpack.c.bf16 %v1229_v10, %v1227_v9 }
 0x6b0   :  { %1863 = vmatpush1.bf16.msra.mxu0 %v1862_v18  ;;  %v1233_v18 = vld [vmem:[#allocation17 + $0x3b8] sm:$0xff] }
 0x6b1   :  { %1865 = vmatprep.subr.bf16.mxu0 %v1864_v19  ;;  %v1902_v19 = vpack.c.bf16 %v1228_v16, %v1226_v15  ;;  %v1904_v20 = vpack.c.bf16 %v1233_v18, %v1231_v17 }
 0x6b4   :  { %1867 = vmatpush1.bf16.msra.mxu0 %v1866_v3  ;;  %v1237_v3 = vld [vmem:[#allocation17 + $0x3d8] sm:$0xff] }
 0x6b5   :  { %1869 = vmatprep.subr.bf16.mxu0 %v1868_v24  ;;  %v1906_v24 = vpack.c.bf16 %v1232_v22, %v1230_v21  ;;  %v1908_v25 = vpack.c.bf16 %v1237_v3, %v1235_v23 }
 0x6b8   :  { %1871 = vmatpush1.bf16.msra.mxu0 %v1870_v29  ;;  %v1239_v29 = vld [vmem:[#allocation17 + $0x3e8] sm:$0xff] }
 0x6b9   :  { %1873 = vmatprep.subr.bf16.mxu0 %v1872_v30  ;;  %v1241_v30 = vld [vmem:[#allocation17 + $0x3f8] sm:$0xff] }
 0x6ba   :  { %v1912_v13 = vpack.c.bf16 %v1241_v30, %v1239_v29 }
 0x6bc   :  { %1875 = vmatpush1.bf16.msra.mxu0 %v1874_v34  ;;  %v1240_v34 = vld [vmem:[#allocation17 + $0x3f0] sm:$0xff] }
 0x6bd   :  { %1877 = vmatprep.subr.bf16.mxu0 %v1876_v35  ;;  %v1914_v35 = vpack.c.bf16 %v1240_v34, %v1238_v33 }
 0x6c0   :  { %1879 = vmatpush1.bf16.msra.mxu0 %v1878_v40  ;;  %v1249_v40 = vrot.slane %v2457_v49, %v1244_v38 }
 0x6c1   :  { %1881 = vmatprep.subr.bf16.mxu0 %v1880_v41 }
 0x6c4   :  { %1883 = vmatpush1.bf16.msra.mxu0 %v1882_v47 }
 0x6c5   :  { %1885 = vmatprep.subr.bf16.mxu0 %v1884_v48 }
 0x6c8   :  { %1887 = vmatpush1.bf16.msra.mxu0 %v1886_v55 }
 0x6c9   :  { %1889 = vmatprep.subr.bf16.mxu0 %v1888_v56 }
 0x6cc   :  { %1891 = vmatpush1.bf16.msra.mxu0 %v1890_v61 }
 0x6cd   :  { %1893 = vmatprep.subr.bf16.mxu0 %v1892_v62 }
 0x6d0   :  { %1895 = vmatpush1.bf16.msra.mxu0 %v1894_v5 }
 0x6d1   :  { %1897 = vmatprep.subr.bf16.mxu0 %v1896_v6 }
 0x6d4   :  { %1899 = vmatpush1.bf16.msra.mxu0 %v1898_v12 }
 0x6d5   :  { %1901 = vmatprep.subr.bf16.mxu0 %v1900_v14 }
 0x6d8   :  { %1903 = vmatpush1.bf16.msra.mxu0 %v1902_v19 }
 0x6d9   :  { %1905 = vmatprep.subr.bf16.mxu0 %v1904_v20 }
 0x6dc   :  { %1907 = vmatpush1.bf16.msra.mxu0 %v1906_v24 }
 0x6dd   :  { %1909 = vmatprep.subr.bf16.mxu0 %v1908_v25 }
 0x6e0   :  { %1911 = vmatpush1.bf16.msra.mxu0 %v1910_v31 }
 0x6e1   :  { %1913 = vmatprep.subr.bf16.mxu0 %v1912_v13 }
 0x6e4   :  { %1915 = vmatpush1.bf16.msra.mxu0 %v1914_v35 }
 0x6e7   :  { %1386 = vmatmul.mubr.f32.vlgmr.msra.gmra.mrb[8].mxu0 %v1112_v37 }
 0x7ba   :  { %v1387_v41 = vpop.f32.mrb[8].mxu0 }
 0x7bb   :  { %v1916_v46 = vadd.f32 %v1387_v41, %v1245_v39  ;;  %v1389_v42 = vpop.f32.mrb[9].mxu0 }
 0x7bc   :  { %v1917_v43 = vadd.f32 %v1389_v42, %v1249_v40 }
 0x7bd   :  { %v1429_v44 = vmul.f32 -1.442695, %v1916_v46 }
 0x7be   :  { %v1430_v45 = vmul.f32 -1.442695, %v1917_v43 }
 0x7bf   :  { %1940 = vpow2.f32 %v1429_v44 }
 0x7c0   :  { %1942 = vpow2.f32 %v1430_v45 }
 0x7c9   :  { %v1941_v47 = vpop.eup %1940 }
 0x7ca   :  { %v1943_v53 = vpop.eup %1942  ;;  %v1398_v48 = vadd.f32 1.0, %v1941_v47 }
 0x7cb   :  { %v1399_v50 = vadd.f32 1.0, %v1943_v53 }
 0x7cc   :  { %1944 = vrcp.f32 %v1398_v48 }
 0x7cd   :  { %1946 = vrcp.f32 %v1399_v50 }
 0x7d6   :  { %v1945_v11 = vpop.eup %1944 }
 0x7d7   :  { %v1947_v2 = vpop.eup %1946  ;;  %1404 = vst [vmem:[#allocation19] sm:$0xff] %v1945_v11 }
 0x7d8   :  { %1405 = vst [vmem:[#allocation19 + $0x8] sm:$0xff] %v1947_v2 }
 0x7d9   :  { %2181 = shalt.err (!%p2178_p0)
}
 0x7da   :  { %s2182_s14 = scalar_lea.hbm %s2491_s10, 256 }
 0x7db   :  { %p2183_p1 = scmp.ne.s32.totalorder %s2491_s10, %s2182_s14  ;;  %p2186_p2 = scmp.lt.u32.totalorder %s2182_s14, %s2491_s10 }
 0x7dd   :  { %p2188_p3 = pnand %p2186_p2, %p2183_p1 }
 0x7df   :  { %2191 = shalt.err (!%p2188_p3)
}
 0x7e0   :  { %1415 = dma.vmem_to_hbm [thread:$0]  %s1413_s3, 256, %s2491_s10, [#allocation4]  }
 0x7e1   :  { %2204 = dma.done.wait [#allocation4], 256  }
 0x7e2   :  { %2205 = vsyncadd [#allocation4], 4294967040 }
 0x7e3   :  { %1419 = vsyncpa [#allocation3], 1 }
 0x7e4   :  { %1420 = vsyncpa [#allocation6], 1 }
 0x7e5   :  { %1421 = vsyncpa [#allocation9], 1 }
 0x7e6   :  { %1422 = vsyncpa [#allocation12], 1 }
 0x7e7   :  { %1423 = vsyncpa [#allocation15], 1 }
 0x7e8   :  { %1424 = vsyncpa [#allocation18], 1 }
 0x7e9   :  { %1425 = vsyncpa [#allocation4], 1 }

</bundles_post_ra>
